<compile_context>
chip_gen: v7x
topology: tpu7x:2x2x1
jax: 0.10.0
libtpu: 0.0.40
codegen_flags: <defaults>
</compile_context>

<pallas_src>
import functools

import jax
import jax.numpy as jnp
from jax.experimental import pallas as pl
from jax.experimental.pallas import tpu as pltpu


def _step_vmem_bytes(tile_h, W, K, hid):
    """Rough per-grid-step VMEM working set in bytes."""
    n_pix = tile_h * W
    patches = n_pix * K * 2            # bf16 patch tile built in VMEM
    acc = n_pix * 4 * hid * 4          # f32 gate accumulator
    state = 2 * 3 * n_pix * hid * 4    # double-buffered c_in / h_out / c_out blocks
    return patches + acc + state


def _pick_tile_h(B, H, W, K, hid, vmem_budget_bytes=8 << 20):
    """Largest divisor of H that fits the VMEM budget; then split further (if
    possible) so the grid has >= 4 steps (>= 2 per TensorCore on v7x).  On
    single-TC v5e/v6e the extra steps only cost ~0.35 us each and buy
    DMA/compute overlap."""
    divisors = [d for d in range(1, H + 1) if H % d == 0]
    fitting = [d for d in divisors
               if _step_vmem_bytes(d, W, K, hid) <= vmem_budget_bytes]
    if not fitting:
        fitting = [1]
    tile_h = max(fitting)
    if B * (H // tile_h) < 4:
        smaller = [d for d in fitting if B * (H // d) >= 4]
        if smaller:
            tile_h = max(smaller)
    return tile_h


def _convlstm_kernel(comb_ref, w_ref, b_ref, c_ref, h_out_ref, c_out_ref, *,
                     tile_h, W, KH, KW, Ctot, hid, ph):
    """One grid step = one batch element x one tile of `tile_h` output rows.

    comb_ref  : (H_pad, W_pad, Ctot)  halo-padded [x, h] block, bf16 (resident
                across the inner h-tile axis for this batch element)
    w_ref     : (K, 4*hid)            conv weights, bf16, VMEM resident
    b_ref     : (1, 4*hid)            bias, f32, VMEM resident
    c_ref     : (tile_h, W, hid)      current cell state, f32
    h_out_ref : (tile_h, W, hid)
    c_out_ref : (tile_h, W, hid)
    """
    i_h = pl.program_id(1)
    row0 = pl.multiple_of(i_h * tile_h, tile_h)
    # Halo window of the padded input for this row tile (VMEM -> vregs).
    win = comb_ref[pl.ds(row0, tile_h + 2 * ph), :, :]   # (tile_h+2ph, W_pad, Ctot)

    n_pix = tile_h * W
    # In-VMEM im2col: lane-axis concat of the KH*KW shifted windows, ordered to
    # match w.reshape(KH*KW*Ctot, 4*hid) (ki major, kj, then channels).
    taps = []
    for ki in range(KH):
        for kj in range(KW):
            taps.append(win[ki:ki + tile_h, kj:kj + W, :].reshape(n_pix, Ctot))
    patches = jnp.concatenate(taps, axis=-1)              # (n_pix, K) bf16

    # Single wide MXU matmul: bf16 x bf16 -> f32 accumulate.
    # (4*hid = 128 half-fills a 256-wide MXU on v6e/v7x; intentionally not
    #  padded — the kernel is DMA-bound.)
    acc = jnp.dot(patches, w_ref[...],
                  preferred_element_type=jnp.float32)      # (n_pix, 4*hid)
    acc = acc + b_ref[...]                                 # broadcast bias add

    # Gates stacked along lanes: [i | f | o | g], each `hid` columns.
    sig = jax.nn.sigmoid(acc[:, :3 * hid])                 # one EUP pass (i,f,o)
    g = jnp.tanh(acc[:, 3 * hid:])                         # one EUP pass (g)
    i = sig[:, 0 * hid:1 * hid]
    f = sig[:, 1 * hid:2 * hid]
    o = sig[:, 2 * hid:3 * hid]

    c_cur = c_ref[...].astype(jnp.float32).reshape(n_pix, hid)
    c_next = f * c_cur + i * g
    h_next = o * jnp.tanh(c_next)

    c_out_ref[...] = c_next.reshape(tile_h, W, hid).astype(c_out_ref.dtype)
    h_out_ref[...] = h_next.reshape(tile_h, W, hid).astype(h_out_ref.dtype)


def conv_lstm_cell(x, h_cur, c_cur, w, b, *, tile_h=None):
    """ConvLSTMCell.forward.

    x      : (B, H, W, Cin)              NHWC
    h_cur  : (B, H, W, hid)              NHWC
    c_cur  : (B, H, W, hid)              NHWC
    w      : (KH, KW, Cin+hid, 4*hid)    HWIO
    b      : (4*hid,)
    returns (h_next, c_next), both (B, H, W, hid).
    """
    B, H, W, Cin = x.shape
    hid = h_cur.shape[-1]
    KH, KW, Ctot, four_hid = w.shape
    assert Ctot == Cin + hid and four_hid == 4 * hid
    assert KH % 2 == 1 and KW % 2 == 1, "use odd kernel sizes for 'same' output"
    ph, pw = KH // 2, KW // 2
    H_pad, W_pad = H + 2 * ph, W + 2 * pw
    K = KH * KW * Ctot

    if tile_h is None:
        tile_h = _pick_tile_h(B, H, W, K, hid)
    assert H % tile_h == 0, "tile_h must divide H (no silent tail rows)"
    n_h = H // tile_h

    # --- minimal wrapper glue: channel concat + 'same' halo pad + bf16 cast --
    # TODO(synk): for long sequences, fold the concat/pad/cast into the kernel
    # by passing x and h as separate halo blocks (and, for very large feature
    # maps, keep comb in HBM via memory_space=pl.ANY with manual per-tile halo
    # DMAs instead of holding the full padded image block in VMEM).
    comb = jnp.concatenate([x, h_cur], axis=-1)                     # (B,H,W,Ctot)
    comb_p = jnp.pad(comb, ((0, 0), (ph, ph), (pw, pw), (0, 0)))
    comb_p = comb_p.astype(jnp.bfloat16)                            # (B,H_pad,W_pad,Ctot)
    w_flat = w.reshape(K, 4 * hid).astype(jnp.bfloat16)             # (K, 4*hid)
    b_row = b.reshape(1, 4 * hid).astype(jnp.float32)               # (1, 4*hid)

    # Scoped-VMEM request: resident comb/weights + per-step working set, x2
    # headroom; floored at 32 MiB (above v5e's 16 MiB default), capped for v7x.
    resident = (2 * H_pad * W_pad * Ctot * 2       # comb block (double-buffered)
                + K * 4 * hid * 2 + 4 * hid * 4)   # weights + bias (resident)
    vmem_limit = int(min(64 << 20,
                         max(32 << 20,
                             2 * (resident + _step_vmem_bytes(tile_h, W, K, hid)))))

    kernel = functools.partial(_convlstm_kernel, tile_h=tile_h, W=W, KH=KH,
                               KW=KW, Ctot=Ctot, hid=hid, ph=ph)
    out_struct = jax.ShapeDtypeStruct((B, H, W, hid), x.dtype)

    h_next, c_next = pl.pallas_call(
        kernel,
        out_shape=(out_struct, out_struct),
        grid=(B, n_h),
        in_specs=[
            # Halo block: constant over the inner h-tile axis -> fetched once
            # per batch element.
            pl.BlockSpec((None, H_pad, W_pad, Ctot), lambda bb, ii: (bb, 0, 0, 0)),
            # Weights / bias: constant index_map -> VMEM resident all steps.
            pl.BlockSpec((K, 4 * hid), lambda bb, ii: (0, 0)),
            pl.BlockSpec((1, 4 * hid), lambda bb, ii: (0, 0)),
            pl.BlockSpec((None, tile_h, W, hid), lambda bb, ii: (bb, ii, 0, 0)),
        ],
        out_specs=[
            pl.BlockSpec((None, tile_h, W, hid), lambda bb, ii: (bb, ii, 0, 0)),
            pl.BlockSpec((None, tile_h, W, hid), lambda bb, ii: (bb, ii, 0, 0)),
        ],
        compiler_params=pltpu.CompilerParams(
            dimension_semantics=("parallel", "parallel"),
            vmem_limit_bytes=vmem_limit),
    )(comb_p, w_flat, b_row, c_cur)
    return h_next, c_next


def conv_lstm_cell_ref(x, h_cur, c_cur, w, b):
    """Pure-JAX reference (mirrors the PyTorch forward, NHWC layout)."""
    KH, KW = w.shape[0], w.shape[1]
    hid = h_cur.shape[-1]
    comb = jnp.concatenate([x, h_cur], axis=-1)
    conv = jax.lax.conv_general_dilated(
        comb, w, window_strides=(1, 1),
        padding=[(KH // 2, KH // 2), (KW // 2, KW // 2)],
        dimension_numbers=("NHWC", "HWIO", "NHWC"),
        precision=jax.lax.Precision.HIGHEST) + b
    cc_i = conv[..., 0 * hid:1 * hid]
    cc_f = conv[..., 1 * hid:2 * hid]
    cc_o = conv[..., 2 * hid:3 * hid]
    cc_g = conv[..., 3 * hid:4 * hid]
    i = jax.nn.sigmoid(cc_i)
    f = jax.nn.sigmoid(cc_f)
    o = jax.nn.sigmoid(cc_o)
    g = jnp.tanh(cc_g)
    c_next = f * c_cur + i * g
    h_next = o * jnp.tanh(c_next)
    return h_next, c_next


if __name__ == "__main__":
    # Module config: input_size=(16,16), input_dim=4, hidden_dim=32,
    # kernel_size=(3,3), bias=True.
    B, H, W, Cin, HID = 2, 16, 16, 4, 32
    KH, KW = 3, 3
    Ctot = Cin + HID

    key = jax.random.PRNGKey(0)
    k1, k2, k3, k4, k5 = jax.random.split(key, 5)
    x = jax.random.normal(k1, (B, H, W, Cin), jnp.float32)
    h_cur = jax.random.normal(k2, (B, H, W, HID), jnp.float32)
    c_cur = jax.random.normal(k3, (B, H, W, HID), jnp.float32)

    # Deterministic synthetic conv parameters (kaiming-ish scale).
    fan_in = Ctot * KH * KW
    w = jax.random.normal(k4, (KH, KW, Ctot, 4 * HID), jnp.float32) * (2.0 / fan_in) ** 0.5
    b = jax.random.normal(k5, (4 * HID,), jnp.float32) * 0.01

    h_next, c_next = conv_lstm_cell(x, h_cur, c_cur, w, b)
    jax.block_until_ready((h_next, c_next))
    assert h_next.shape == (B, H, W, HID) and c_next.shape == (B, H, W, HID)

    # Apples-to-apples check: reference fed the same bf16-rounded MXU operands
    # (f32 accumulation in both) — should match tightly.
    xq = x.astype(jnp.bfloat16).astype(jnp.float32)
    hq = h_cur.astype(jnp.bfloat16).astype(jnp.float32)
    wq = w.astype(jnp.bfloat16).astype(jnp.float32)
    h_refq, c_refq = conv_lstm_cell_ref(xq, hq, c_cur, wq, b)
    assert jnp.allclose(h_next, h_refq, atol=2e-3, rtol=2e-3)
    assert jnp.allclose(c_next, c_refq, atol=2e-3, rtol=2e-3)

    # Full-f32 module semantics (loose tolerance covers the bf16 MXU operands).
    h_ref, c_ref = conv_lstm_cell_ref(x, h_cur, c_cur, w, b)
    assert jnp.allclose(h_next, h_ref, atol=5e-2, rtol=5e-2)
    assert jnp.allclose(c_next, c_ref, atol=5e-2, rtol=5e-2)

    print("KERNEL_OK")
</pallas_src>

<mosaic_0001>
module attributes {stable_mosaic.version = 11 : i64} {
  func.func @_convlstm_kernel(%arg0: i32, %arg1: i32, %arg2: memref<1x18x18x36xbf16, #tpu.memory_space<vmem>>, %arg3: memref<324x128xbf16, #tpu.memory_space<vmem>>, %arg4: memref<1x128xf32, #tpu.memory_space<vmem>>, %arg5: memref<1x8x16x32xf32, #tpu.memory_space<vmem>>, %arg6: memref<1x8x16x32xf32, #tpu.memory_space<vmem>>, %arg7: memref<1x8x16x32xf32, #tpu.memory_space<vmem>>) attributes {dimension_semantics = [#tpu.dimension_semantics<parallel>, #tpu.dimension_semantics<parallel>], iteration_bounds = array<i64: 2, 2>, scalar_prefetch = 0 : i64, scratch_operands = 0 : i64, tpu.core_type = #tpu.core_type<tc>, window_params = [{transform_indices = @transform_0, window_bounds = array<i64: 1, 18, 18, 36>}, {pipeline_mode = #tpu.pipeline_mode<synchronous>, transform_indices = @transform_1, window_bounds = array<i64: 324, 128>}, {pipeline_mode = #tpu.pipeline_mode<synchronous>, transform_indices = @transform_2, window_bounds = array<i64: 1, 128>}, {transform_indices = @transform_3, window_bounds = array<i64: 1, 8, 16, 32>}, {transform_indices = @transform_4, window_bounds = array<i64: 1, 8, 16, 32>}, {transform_indices = @transform_5, window_bounds = array<i64: 1, 8, 16, 32>}]} {
    %c8_i32 = arith.constant 8 : i32
    %0 = arith.muli %arg1, %c8_i32 : i32
    %1 = tpu.assume_multiple %0, 8 : i32
    %c0 = arith.constant 0 : index
    %2 = arith.index_cast %1 : i32 to index
    %c0_0 = arith.constant 0 : index
    %c0_1 = arith.constant 0 : index
    %3 = vector.load %arg2[%c0, %2, %c0_0, %c0_1] : memref<1x18x18x36xbf16, #tpu.memory_space<vmem>>, vector<1x10x18x36xbf16>
    %4 = vector.shape_cast %3 : vector<1x10x18x36xbf16> to vector<10x18x36xbf16>
    %5 = vector.extract_strided_slice %4 {offsets = [0, 0, 0], sizes = [8, 16, 36], strides = [1, 1, 1]} : vector<10x18x36xbf16> to vector<8x16x36xbf16>
    %6 = vector.shape_cast %5 : vector<8x16x36xbf16> to vector<128x36xbf16>
    %7 = vector.extract_strided_slice %4 {offsets = [0, 1, 0], sizes = [8, 16, 36], strides = [1, 1, 1]} : vector<10x18x36xbf16> to vector<8x16x36xbf16>
    %8 = vector.shape_cast %7 : vector<8x16x36xbf16> to vector<128x36xbf16>
    %9 = vector.extract_strided_slice %4 {offsets = [0, 2, 0], sizes = [8, 16, 36], strides = [1, 1, 1]} : vector<10x18x36xbf16> to vector<8x16x36xbf16>
    %10 = vector.shape_cast %9 : vector<8x16x36xbf16> to vector<128x36xbf16>
    %11 = vector.extract_strided_slice %4 {offsets = [1, 0, 0], sizes = [8, 16, 36], strides = [1, 1, 1]} : vector<10x18x36xbf16> to vector<8x16x36xbf16>
    %12 = vector.shape_cast %11 : vector<8x16x36xbf16> to vector<128x36xbf16>
    %13 = vector.extract_strided_slice %4 {offsets = [1, 1, 0], sizes = [8, 16, 36], strides = [1, 1, 1]} : vector<10x18x36xbf16> to vector<8x16x36xbf16>
    %14 = vector.shape_cast %13 : vector<8x16x36xbf16> to vector<128x36xbf16>
    %15 = vector.extract_strided_slice %4 {offsets = [1, 2, 0], sizes = [8, 16, 36], strides = [1, 1, 1]} : vector<10x18x36xbf16> to vector<8x16x36xbf16>
    %16 = vector.shape_cast %15 : vector<8x16x36xbf16> to vector<128x36xbf16>
    %17 = vector.extract_strided_slice %4 {offsets = [2, 0, 0], sizes = [8, 16, 36], strides = [1, 1, 1]} : vector<10x18x36xbf16> to vector<8x16x36xbf16>
    %18 = vector.shape_cast %17 : vector<8x16x36xbf16> to vector<128x36xbf16>
    %19 = vector.extract_strided_slice %4 {offsets = [2, 1, 0], sizes = [8, 16, 36], strides = [1, 1, 1]} : vector<10x18x36xbf16> to vector<8x16x36xbf16>
    %20 = vector.shape_cast %19 : vector<8x16x36xbf16> to vector<128x36xbf16>
    %21 = vector.extract_strided_slice %4 {offsets = [2, 2, 0], sizes = [8, 16, 36], strides = [1, 1, 1]} : vector<10x18x36xbf16> to vector<8x16x36xbf16>
    %22 = vector.shape_cast %21 : vector<8x16x36xbf16> to vector<128x36xbf16>
    %23 = tpu.concatenate %6, %8, %10, %12, %14, %16, %18, %20, %22 in 1 : vector<128x36xbf16>, vector<128x36xbf16>, vector<128x36xbf16>, vector<128x36xbf16>, vector<128x36xbf16>, vector<128x36xbf16>, vector<128x36xbf16>, vector<128x36xbf16>, vector<128x36xbf16> -> vector<128x324xbf16>
    %c0_2 = arith.constant 0 : index
    %c0_3 = arith.constant 0 : index
    %24 = vector.load %arg3[%c0_2, %c0_3] : memref<324x128xbf16, #tpu.memory_space<vmem>>, vector<324x128xbf16>
    %cst = arith.constant dense<0.000000e+00> : vector<128x128xf32>
    %25 = tpu.matmul %23, %24, %cst {dimension_numbers = #tpu.dot_dimension_numbers<[1], [0], [0], [1], [0, 0, 1, 1], [], []>} : vector<128x324xbf16>, vector<324x128xbf16>, vector<128x128xf32> -> vector<128x128xf32>
    %c0_4 = arith.constant 0 : index
    %c0_5 = arith.constant 0 : index
    %26 = vector.load %arg4[%c0_4, %c0_5] : memref<1x128xf32, #tpu.memory_space<vmem>>, vector<1x128xf32>
    %27 = vector.broadcast %26 : vector<1x128xf32> to vector<128x128xf32>
    %28 = arith.addf %25, %27 : vector<128x128xf32>
    %29 = vector.extract_strided_slice %28 {offsets = [0, 0], sizes = [128, 96], strides = [1, 1]} : vector<128x128xf32> to vector<128x96xf32>
    %30 = arith.negf %29 : vector<128x96xf32>
    %31 = math.exp %30 : vector<128x96xf32>
    %cst_6 = arith.constant 1.000000e+00 : f32
    %32 = vector.broadcast %cst_6 : f32 to vector<128x96xf32>
    %33 = arith.addf %32, %31 : vector<128x96xf32>
    %34 = arith.divf %32, %33 : vector<128x96xf32>
    %35 = vector.extract_strided_slice %28 {offsets = [0, 96], sizes = [128, 32], strides = [1, 1]} : vector<128x128xf32> to vector<128x32xf32>
    %36 = math.tanh %35 : vector<128x32xf32>
    %37 = vector.extract_strided_slice %34 {offsets = [0, 0], sizes = [128, 32], strides = [1, 1]} : vector<128x96xf32> to vector<128x32xf32>
    %38 = vector.extract_strided_slice %34 {offsets = [0, 32], sizes = [128, 32], strides = [1, 1]} : vector<128x96xf32> to vector<128x32xf32>
    %39 = vector.extract_strided_slice %34 {offsets = [0, 64], sizes = [128, 32], strides = [1, 1]} : vector<128x96xf32> to vector<128x32xf32>
    %c0_7 = arith.constant 0 : index
    %c0_8 = arith.constant 0 : index
    %c0_9 = arith.constant 0 : index
    %c0_10 = arith.constant 0 : index
    %40 = vector.load %arg5[%c0_7, %c0_8, %c0_9, %c0_10] : memref<1x8x16x32xf32, #tpu.memory_space<vmem>>, vector<1x8x16x32xf32>
    %41 = vector.shape_cast %40 : vector<1x8x16x32xf32> to vector<8x16x32xf32>
    %42 = vector.shape_cast %41 : vector<8x16x32xf32> to vector<128x32xf32>
    %43 = arith.mulf %38, %42 : vector<128x32xf32>
    %44 = arith.mulf %37, %36 : vector<128x32xf32>
    %45 = arith.addf %43, %44 : vector<128x32xf32>
    %46 = math.tanh %45 : vector<128x32xf32>
    %47 = arith.mulf %39, %46 : vector<128x32xf32>
    %48 = vector.shape_cast %45 : vector<128x32xf32> to vector<8x16x32xf32>
    %c0_11 = arith.constant 0 : index
    %c0_12 = arith.constant 0 : index
    %c0_13 = arith.constant 0 : index
    %c0_14 = arith.constant 0 : index
    %49 = vector.load %arg7[%c0_11, %c0_12, %c0_13, %c0_14] : memref<1x8x16x32xf32, #tpu.memory_space<vmem>>, vector<1x8x16x32xf32>
    %50 = vector.shape_cast %49 : vector<1x8x16x32xf32> to vector<8x16x32xf32>
    %51 = vector.shape_cast %48 : vector<8x16x32xf32> to vector<1x8x16x32xf32>
    tpu.vector_store %arg7[%c0_11, %c0_12, %c0_13, %c0_14], %51 {strides = array<i32>} : memref<1x8x16x32xf32, #tpu.memory_space<vmem>>, vector<1x8x16x32xf32>,
    %52 = vector.shape_cast %47 : vector<128x32xf32> to vector<8x16x32xf32>
    %c0_15 = arith.constant 0 : index
    %c0_16 = arith.constant 0 : index
    %c0_17 = arith.constant 0 : index
    %c0_18 = arith.constant 0 : index
    %53 = vector.load %arg6[%c0_15, %c0_16, %c0_17, %c0_18] : memref<1x8x16x32xf32, #tpu.memory_space<vmem>>, vector<1x8x16x32xf32>
    %54 = vector.shape_cast %53 : vector<1x8x16x32xf32> to vector<8x16x32xf32>
    %55 = vector.shape_cast %52 : vector<8x16x32xf32> to vector<1x8x16x32xf32>
    tpu.vector_store %arg6[%c0_15, %c0_16, %c0_17, %c0_18], %55 {strides = array<i32>} : memref<1x8x16x32xf32, #tpu.memory_space<vmem>>, vector<1x8x16x32xf32>,
    return
  }
  func.func @transform_0(%arg0: i32, %arg1: i32) -> (i32, i32, i32, i32) {
    %c0_i32 = arith.constant 0 : i32
    %c0_i32_0 = arith.constant 0 : i32
    %c0_i32_1 = arith.constant 0 : i32
    %c0_i32_2 = arith.constant 0 : i32
    return %arg0, %c0_i32, %c0_i32_0, %c0_i32_1 : i32, i32, i32, i32
  }
  func.func @transform_1(%arg0: i32, %arg1: i32) -> (i32, i32) {
    %c0_i32 = arith.constant 0 : i32
    %c0_i32_0 = arith.constant 0 : i32
    %c0_i32_1 = arith.constant 0 : i32
    return %c0_i32, %c0_i32_0 : i32, i32
  }
  func.func @transform_2(%arg0: i32, %arg1: i32) -> (i32, i32) {
    %c0_i32 = arith.constant 0 : i32
    %c0_i32_0 = arith.constant 0 : i32
    %c0_i32_1 = arith.constant 0 : i32
    return %c0_i32, %c0_i32_0 : i32, i32
  }
  func.func @transform_3(%arg0: i32, %arg1: i32) -> (i32, i32, i32, i32) {
    %c0_i32 = arith.constant 0 : i32
    %c0_i32_0 = arith.constant 0 : i32
    %c0_i32_1 = arith.constant 0 : i32
    return %arg0, %arg1, %c0_i32, %c0_i32_0 : i32, i32, i32, i32
  }
  func.func @transform_4(%arg0: i32, %arg1: i32) -> (i32, i32, i32, i32) {
    %c0_i32 = arith.constant 0 : i32
    %c0_i32_0 = arith.constant 0 : i32
    %c0_i32_1 = arith.constant 0 : i32
    return %arg0, %arg1, %c0_i32, %c0_i32_0 : i32, i32, i32, i32
  }
  func.func @transform_5(%arg0: i32, %arg1: i32) -> (i32, i32, i32, i32) {
    %c0_i32 = arith.constant 0 : i32
    %c0_i32_0 = arith.constant 0 : i32
    %c0_i32_1 = arith.constant 0 : i32
    return %arg0, %arg1, %c0_i32, %c0_i32_0 : i32, i32, i32, i32
  }
}

</mosaic_0001>

<bundles_post_ra>
// kernel: tpu_custom_call.1
= control target key start
LH: loop header
LB: loop body
LE: loop exit
PB: predicated region body
PF: predicated region fallthrough
CT: control target
= control target key end

     0   :  { %11 = vsyncpa [#allocation3], 0  ;;  %s4070_s0 = inlined_call_operand.vmem [shape: bf16[2,18,18,36], index: 0, kind: input, shape index: {}]   ;;  %s4071_s1 = inlined_call_operand.vmem [shape: bf16[324,128], index: 1, kind: input, shape index: {}]   ;;  %s4072_s2 = inlined_call_operand.vmem [shape: f32[1,128], index: 2, kind: input, shape index: {}]   ;;  %s4073_s3 = inlined_call_operand.vmem [shape: f32[2,16,16,32], index: 3, kind: input, shape index: {}]   ;;  %s4074_s4 = inlined_call_operand.hbm [shape: f32[2,16,16,32], index: 4, kind: output, shape index: {0}]   ;;  %s4075_s5 = inlined_call_operand.hbm [shape: f32[2,16,16,32], index: 5, kind: output, shape index: {1}]  }
   0x1   :  { %13 = vsyncpa [#allocation3 + $0x1], 0 }
   0x2   :  { %14 = vsyncpa [#allocation5], 0 }
   0x3   :  { %16 = vsyncpa [#allocation5 + $0x1], 0  ;;  %s2875_s18 = smov 0   ;;  %s2877_s19 = smov 0  }
   0x4   :  { %s2879_s20 = smov 0   ;;  %s2881_s21 = smov 0  }
   0x5   :  { %s2883_s22 = smov 0   ;;  %s2885_s23 = smov 0  }
   0x6   :  { %s2887_s24 = smov 0   ;;  %s2889_s25 = smov 0  }
   0x7 LB: > { %s2235_s26 = sadd.s32 4294967295, %s2829_s25   ;;  %s2236_s27 = sadd.s32 4294967294, %s2829_s25   ;;  %s2829_s25 = sphi %s2889_s25, %s22_s25   ;;  %s2825_s24 = sphi %s2887_s24, %s4091_s24   ;;  %s2821_s23 = sphi %s2885_s23, %s4090_s23   ;;  %s2817_s22 = sphi %s2883_s22, %s4089_s22   ;;  %s2813_s21 = sphi %s2881_s21, %s4088_s21   ;;  %s2809_s20 = sphi %s2879_s20, %s4087_s20   ;;  %s2805_s19 = sphi %s2877_s19, %s4086_s19   ;;  %s2801_s18 = sphi %s2875_s18, %s4085_s18  }
   0x8   : > { %s31_s28 = sadd.s32 1, %s2821_s23  ;;  %s34_s29 = sadd.s32 1, %s2825_s24 }
   0x9   : > { %p32_p0 = scmp.ge.s32.totalorder %s31_s28, 2  ;;  %p149_p1 = scmp.ne.s32.totalorder %s2809_s20, %s2805_s19 }
   0xa   : > { %p150_p2 = scmp.eq.s32.totalorder %s2235_s26, 3  ;;  %p155_p5 = scmp.ne.s32.totalorder %s2805_s19, %s2801_s18 }
   0xb   : > { %s4093_s28 = smov (%p32_p0, %s31_s28), 0  ;;  %s4095_s29 = smov (!%p32_p0, %s34_s29), %s2825_s24 }
   0xc   : > { %s135_s30 = ssub.s32 %s2821_s23, %s4093_s28  ;;  %p2926_p3 = por %p150_p2, %p149_p1 }
   0xd   : > { %p36_p4 = scmp.ge.s32.totalorder %s4095_s29, 2  ;;  %p156_p6 = scmp.eq.s32.totalorder %s2236_s27, 3 }
   0xe   : > { %p2239_p7 = scmp.ge.s32.totalorder %s2829_s25, 1  ;;  %p230_p9 = scmp.lt.s32.totalorder %s2829_s25, 5 }
   0xf   : > { %s4097_s29 = smov (%p36_p4, %s4095_s29), 0  ;;  %p2935_p8 = por %p156_p6, %p155_p5 }
  0x10   : > { %4078 = sst [smem:[#allocation8_spill]] %s4097_s29  ;;  %s134_s8 = ssub.s32 %s2825_s24, %s4097_s29 }
  0x11   : > { %s139_s9 = sadd.s32 1, %s2809_s20  ;;  %s136_s10 = sor.u32 %s135_s30, %s134_s8 }
  0x12   : > { %p231_p10 = pnand %p2239_p7, %p230_p9  ;;  %p137_p11 = scmp.eq.s32.totalorder %s136_s10, 0 }
  0x13   : > { %p273_p12 = scmp.lt.s32.totalorder (!%p231_p10), %s2817_s22, 1  ;;  %v2552_v0 = vld [vmem:[%s4071_s1 + $0x40] sm:$0xff] (!%p231_p10)   ;;  %s2348_s15 = smul.u32 (!%p231_p10), 96, %s2813_s21  ;;  %vm545_vm0 = vcmask (!%p231_p10), 1042432   ;;  %vm546_vm1 = vcmask (!%p231_p10), 1046532   ;;  %v2554_v2 = vld [vmem:[%s4071_s1 + $0x48] sm:$0xff] (!%p231_p10)  }
  0x14   : > { %s2944_s11 = scalar_select %p137_p11, %s2809_s20, %s139_s9  }
  0x15   : > { %234 = sbr.rel (%p231_p10) target bundleno = 1007 (0x3ef), region = 36  ;;  %2351 = vmatprep.subr.bf16.mxu0 (!%p231_p10), %v2552_v0  ;;  %v2553_v1 = vld [vmem:[%s4071_s1] sm:$0xff] (!%p231_p10)   ;;  %vm326_vm2 = vsmask.f32 (!%p231_p10), 3328  ;;  %vm327_vm3 = vsmask.f32 (!%p231_p10), 7440  ;;  %vm3015_vm4 = vmor (!%p231_p10), %vm545_vm0, %vm546_vm1 }
  0x16   : > { %2352 = vmatpush3.bf16.msra.mxu0 (!%p231_p10), %v2553_v1  ;;  %v2555_v3 = vld [vmem:[%s4071_s1 + $0x8] sm:$0xff] (!%p231_p10)   ;;  %v2556_v4 = vld [vmem:[%s4071_s1 + $0x50] sm:$0xff] (!%p231_p10)   ;;  %v2559_v19 = vld [vmem:[%s4071_s1 + $0x58] sm:$0xff] (!%p231_p10)   ;;  %s2831_s8 = smov (!%p231_p10), 108   ;;  %s2832_s13 = smov (!%p231_p10), 88   ;;  %vm1238_vm6 = vcmask (!%p231_p10), 1041408  }
  0x17   : > { %2353 = vmatprep.subr.bf16.mxu0 (!%p231_p10), %v2554_v2  ;;  %v2557_v13 = vld [vmem:[%s4071_s1 + $0x10] sm:$0xff] (!%p231_p10)   ;;  %v2560_v31 = vld [vmem:[%s4071_s1 + $0x18] sm:$0xff] (!%p231_p10)   ;;  %v2561_v45 = vld [vmem:[%s4071_s1 + $0x60] sm:$0xff] (!%p231_p10)   ;;  %s2833_s30 = smov (!%p231_p10), 52   ;;  %s2834_s9 = smov (!%p231_p10), 16   ;;  %vm957_vm7 = vcmask (!%p231_p10), 130048  }
  0x18   : > { %vm3043_vm5 = vmor (!%p231_p10), %vm326_vm2, %vm327_vm3  ;;  %v2562_v60 = vld [vmem:[%s4071_s1 + $0x20] sm:$0xff] (!%p231_p10)   ;;  %v2563_v1 = vld [vmem:[%s4071_s1 + $0x68] sm:$0xff] (!%p231_p10)   ;;  %s2836_s17 = smov (!%p231_p10), 124   ;;  %s2837_s27 = smov (!%p231_p10), 36   ;;  %vm974_vm8 = vcmask (!%p231_p10), 424960   ;;  %vm991_vm9 = vcmask (!%p231_p10), 719872  }
  0x19   : > { %s2243_s14 = sshll.u32 (!%p231_p10), %s2813_s21, 3  ;;  %vm1008_vm10 = vcmask (!%p231_p10), 1014784   ;;  %vm890_vm11 = vcmask (!%p231_p10), 293888   ;;  %vm915_vm12 = vcmask (!%p231_p10), 588800   ;;  %vm932_vm13 = vcmask (!%p231_p10), 883712  }
  0x1a   : > { %2354 = vmatpush3.bf16.msra.mxu0 (!%p231_p10), %v2555_v3  ;;  %p281_p13 = scmp.lt.s32.totalorder (!%p231_p10), %s2243_s14, 15  ;;  %vm1033_vm14 = vcmask (!%p231_p10), 261120   ;;  %vm1221_vm15 = vcmask (!%p231_p10), 556032  }
  0x1b   : > { %2355 = vmatprep.subr.bf16.mxu0 (!%p231_p10), %v2556_v4 }
  0x1c   : > { %s2948_s12 = scalar_select %p273_p12, %s2817_s22, 1 }
  0x1d   : > { %s4099_s14 = smov (!%p281_p13, %s2243_s14), 15 }
  0x1e   : > { %s2455_s16 = smul.u32 216, %s2948_s12  ;;  %2356 = vmatpush3.bf16.msra.mxu0 %v2557_v13 }
  0x1f   : > { %2357 = vmatprep.subr.bf16.mxu0 %v2559_v19  ;;  %v2564_v19 = vld [vmem:[%s4071_s1 + $0x28] sm:$0xff]  }
  0x20   : > { %s277_s10 = scalar_lea.vmem %s4070_s0, %s2455_s16  ;;  %s2839_s16 = smov 96  }
  0x21   : > { %s2967_s29 = scalar_lea.vmem %s277_s10, %s2348_s15  ;;  %s2835_s15 = smov 72  }
  0x22   : > { %v2973_v5 = vld [vmem:[%s2967_s29 + $0x18] sm:$0xf]  ;;  %v2976_v6 = vld [vmem:[%s2967_s29 + $0x1c] sm:$0xf]  ;;  %v299_v7 = vld [vmem:[%s2967_s29 + $0xc] sm:$0xf]  ;;  %2358 = vmatpush3.bf16.msra.mxu0 %v2560_v31 }
  0x23   : > { %v391_v8 = vshrl.u32 %v2976_v6, 16  ;;  %v2982_v9 = vcombine.low %v2973_v5, %v2976_v6  ;;  %v378_v10 = vshrl.u32 %v2973_v5, 16  ;;  %v381_v11 = vshll.u32 %v2973_v5, 16  ;;  %v300_v12 = vld [vmem:[%s2967_s29 + $0x10] sm:$0xf]  ;;  %2359 = vmatprep.subr.bf16.mxu0 %v2561_v45  ;;  %s2838_s10 = smov 32  }
  0x24   : > { %v363_v14 = vshll.u32 %v300_v12, 16  ;;  %v367_v15 = vshrl.u32 %v300_v12, 16  ;;  %v2990_v16 = vcombine.low %v299_v7, %v300_v12  ;;  %v354_v17 = vshrl.u32 %v299_v7, 16  ;;  %v2993_v18 = vld [vmem:[%s2967_s29 + $0x24] sm:$0xf]  ;;  %v2566_v45 = vld [vmem:[%s4071_s1 + $0x30] sm:$0xff]  }
  0x25   : > { %781 = vrot.lane.b32.xlu1 %v2982_v9, %s2831_s8  ;;  %v357_v20 = vshll.u32 %v299_v7, 16  ;;  %v3001_v21 = vld [vmem:[%s2967_s29 + $0x28] sm:$0xf]  ;;  %v402_v22 = vshrl.u32 %v2993_v18, 16  ;;  %v405_v23 = vshll.u32 %v2993_v18, 16  ;;  %v2251_v24 = vrot.slane %v299_v7, 9 }
  0x26   : > { %v369_v25 = vrot.slane %v367_v15, 4  ;;  %779 = vrot.lane.b32.xlu0 %v2990_v16, %s2831_s8  ;;  %v356_v26 = vrot.slane %v354_v17, 4  ;;  %v415_v27 = vshrl.u32 %v3001_v21, 16  ;;  %v3010_v28 = vcombine.low %v2993_v18, %v3001_v21  ;;  %v301_v29 = vld [vmem:[%s2967_s29 + $0x14] sm:$0x1]  ;;  %2360 = vmatpush3.bf16.msra.mxu0 %v2562_v60 }
  0x27   : > { %v359_v32 = vrot.slane %v357_v20, 5  ;;  %v557_v33 = vrot.slane %v300_v12, 5  ;;  %v560_v34 = vrot.slane %v301_v29, 5  ;;  %v365_v35 = vrot.slane %v363_v14, 5  ;;  %v3023_v36 = vld [vmem:[%s2967_s29] sm:$0xf]  ;;  %2361 = vmatprep.subr.bf16.mxu0 %v2563_v1 }
  0x28   : > { %v373_v37 = vshll.u32 %v301_v29, 16  ;;  %v3026_v38 = vld [vmem:[%s2967_s29 + $0x4] sm:$0xf]  ;;  %v3029_v39 = vld [vmem:[%s2967_s29 + $0x8] sm:$0x1]  ;;  %v2250_v40 = vrot.slane %v3023_v36, 9 }
  0x29   : > { %838 = vrot.lane.b32.xlu1 %v3010_v28, %s2832_s13  ;;  %v558_v41 = vsel %vm3015_vm4, %v2251_v24, %v557_v33  ;;  %v559_v42 = vrot.slane %v557_v33, 4  ;;  %v360_v43 = vor.u32 %v359_v32, %v356_v26  ;;  %v370_v44 = vor.u32 %v369_v25, %v365_v35  ;;  %v304_v54 = vld [vmem:[%s2967_s29 + $0x20] sm:$0x1]  ;;  %v2565_v25 = vld [vmem:[%s4071_s1 + $0x70] sm:$0xff]  }
  0x2a   : > { %836 = vrot.lane.b32.xlu0 %v2982_v9, %s2832_s13  ;;  %v375_v47 = vrot.slane %v373_v37, 5  ;;  %v550_v48 = vrot.slane %v3026_v38, 5  ;;  %v553_v49 = vrot.slane %v3029_v39, 5  ;;  %v380_v50 = vrot.slane %v378_v10, 4  ;;  %v3098_v37 = vld [vmem:[%s2967_s29 + $0x2c] sm:$0x1]  ;;  %2362 = vmatpush3.bf16.msra.mxu0 %v2564_v19 }
  0x2b   : > { %v561_v51 = vsel %vm3015_vm4, %v559_v42, %v560_v34  ;;  %v361_v52 = vrot.slane %v360_v43, 4  ;;  %v371_v53 = vrot.slane %v370_v44, 4  ;;  %v383_v55 = vrot.slane %v381_v11, 5  ;;  %2363 = vmatprep.subr.bf16.mxu0 %v2565_v25 }
  0x2c   : > { %v3052_v56 = vcombine.low %v558_v41, %v561_v51  ;;  %v551_v57 = vsel %vm3015_vm4, %v2250_v40, %v550_v48  ;;  %v552_v58 = vrot.slane %v550_v48, 4  ;;  %v387_v59 = vshll.u32 %v2976_v6, 16 }
  0x2d   : > { %v366_v61 = vsel %vm3043_vm5, %v361_v52, %v365_v35  ;;  %v376_v62 = vsel %vm3043_vm5, %v371_v53, %v375_v47  ;;  %v384_v63 = vor.u32 %v383_v55, %v380_v50  ;;  %v393_v0 = vrot.slane %v391_v8, 4 }
  0x2e   : > { %817 = vrot.lane.b32.xlu1 %v3052_v56, %s2833_s30  ;;  %v3071_v2 = vcombine.low %v366_v61, %v376_v62  ;;  %v554_v3 = vsel %vm3015_vm4, %v552_v58, %v553_v49  ;;  %v389_v4 = vrot.slane %v387_v59, 5  ;;  %v397_v7 = vshll.u32 %v304_v54, 16  ;;  %v3114_v49 = vld [vmem:[%s2967_s29 + $0x30] sm:$0xf]  ;;  %2364 = vmatpush3.bf16.msra.mxu0 %v2566_v45 }
  0x2f   : > { %v2276_v10 = vcombine.low %v551_v57, %v554_v3  ;;  %v385_v11 = vrot.slane %v384_v63, 4  ;;  %v2252_v8 = vrot.slane %v2973_v5, 9  ;;  %v564_v12 = vrot.slane %v2976_v6, 5  ;;  %v3128_v57 = vld [vmem:[%s2967_s29 + $0x34] sm:$0xf] }
  0x30   : > { %798 = vrot.lane.b32.xlu0 %v3071_v2, %s2834_s9  ;;  %v394_v13 = vor.u32 %v393_v0, %v389_v4  ;;  %v399_v14 = vrot.slane %v397_v7, 5  ;;  %v567_v15 = vrot.slane %v304_v54, 5  ;;  %v330_v17 = vshrl.u32 %v3023_v36, 16  ;;  %v2567_v54 = vld [vmem:[%s4071_s1 + $0x78] sm:$0xff]  }
  0x31   : > { %v390_v5 = vsel %vm3043_vm5, %v385_v11, %v389_v4  ;;  %v565_v6 = vsel %vm3015_vm4, %v2252_v8, %v564_v12  ;;  %v566_v20 = vrot.slane %v564_v12, 4  ;;  %v333_v24 = vshll.u32 %v3023_v36, 16  ;;  %v310_v63 = vld [vmem:[%s2967_s29 + $0x38] sm:$0x1]  ;;  %2365 = vmatprep.subr.bf16.mxu0 %v2567_v54  ;;  %v3145_v8 = vld [vmem:[%s2967_s29 + $0x3c] sm:$0xf] }
  0x32   : > { %760 = vrot.lane.b32.xlu1 %v2276_v10, %s2835_s15  ;;  %v395_v26 = vrot.slane %v394_v13, 4  ;;  %v332_v29 = vrot.slane %v330_v17, 4  ;;  %v339_v31 = vshll.u32 %v3026_v38, 16  ;;  %v343_v32 = vshrl.u32 %v3026_v38, 16 }
  0x33   : > { %v568_v33 = vsel %vm3015_vm4, %v566_v20, %v567_v15  ;;  %v335_v34 = vrot.slane %v333_v24, 5  ;;  %v349_v35 = vshll.u32 %v3029_v39, 16  ;;  %v404_v40 = vrot.slane %v402_v22, 4  ;;  %v3150_v15 = vld [vmem:[%s2967_s29 + $0x40] sm:$0xf] }
  0x34   : > { %v400_v41 = vsel %vm3043_vm5, %v395_v26, %v399_v14  ;;  %v3104_v42 = vcombine.low %v565_v6, %v568_v33  ;;  %v341_v43 = vrot.slane %v339_v31, 5  ;;  %v345_v44 = vrot.slane %v343_v32, 4 }
  0x35   : > { %v3109_v47 = vcombine.low %v390_v5, %v400_v41  ;;  %v336_v39 = vor.u32 %v335_v34, %v332_v29  ;;  %v351_v48 = vrot.slane %v349_v35, 5  ;;  %v407_v22 = vrot.slane %v405_v23, 5 }
  0x36   : > { %819 = vrot.lane.b32.xlu1 %v3104_v42, %s2833_s30  ;;  %v346_v50 = vor.u32 %v345_v44, %v341_v43  ;;  %v411_v51 = vshll.u32 %v3001_v21, 16  ;;  %v417_v52 = vrot.slane %v415_v27, 4  ;;  %v421_v53 = vshll.u32 %v3098_v37, 16  ;;  %v2569_v27 = vld [vmem:[%s4071_s1 + $0x38] sm:$0xff]  }
  0x37   : > { %855 = vrot.lane.b32.xlu0 %v3109_v47, %s2836_s17  ;;  %v337_v23 = vrot.slane %v336_v39, 4  ;;  %v408_v55 = vor.u32 %v407_v22, %v404_v40  ;;  %v426_v3 = vshrl.u32 %v3114_v49, 16  ;;  %v429_v4 = vshll.u32 %v3114_v49, 16  ;;  %2366 = vmatpush3.bf16.msra.mxu0 %v2569_v27 }
  0x38   : > { %v347_v58 = vrot.slane %v346_v50, 4  ;;  %v413_v59 = vrot.slane %v411_v51, 5  ;;  %v423_v62 = vrot.slane %v421_v53, 5  ;;  %v571_v10 = vrot.slane %v3001_v21, 5 }
  0x39   : > { %v342_v60 = vsel %vm3043_vm5, %v337_v23, %v341_v43  ;;  %v409_v61 = vrot.slane %v408_v55, 4  ;;  %v439_v11 = vshrl.u32 %v3128_v57, 16  ;;  %v428_v14 = vrot.slane %v426_v3, 4 }
  0x3a   : > { %v352_v0 = vsel %vm3043_vm5, %v347_v58, %v351_v48  ;;  %v418_v1 = vor.u32 %v417_v52, %v413_v59  ;;  %v431_v17 = vrot.slane %v429_v4, 5  ;;  %v435_v19 = vshll.u32 %v3128_v57, 16 }
  0x3b   : > { %800 = vrot.lane.b32.xlu0 %v3109_v47, %s2834_s9  ;;  %v2268_v7 = vcombine.low %v342_v60, %v352_v0  ;;  %v414_v12 = vsel %vm3043_vm5, %v409_v61, %v413_v59  ;;  %v441_v5 = vrot.slane %v439_v11, 4  ;;  %v445_v21 = vshll.u32 %v310_v63, 16  ;;  %v3219_v11 = vld [vmem:[%s2967_s29 + $0x50] sm:$0x1] }
  0x3c   : > { %v419_v13 = vrot.slane %v418_v1, 4  ;;  %v2253_v20 = vrot.slane %v2993_v18, 9  ;;  %v574_v24 = vrot.slane %v3098_v37, 5  ;;  %v578_v25 = vrot.slane %v3128_v57, 5  ;;  %v3210_v1 = vld [vmem:[%s2967_s29 + $0x4c] sm:$0xf] }
  0x3d   : > { %720 = vrot.lane.b32.xlu1 %v2268_v7, %s2837_s27  ;;  %v573_v29 = vrot.slane %v571_v10, 4  ;;  %v432_v31 = vor.u32 %v431_v17, %v428_v14  ;;  %v437_v32 = vrot.slane %v435_v19, 5  ;;  %v2254_v33 = vrot.slane %v3114_v49, 9  ;;  %v3239_v19 = vld [vmem:[%s2967_s29 + $0x58] sm:$0xf] }
  0x3e   : > { %v424_v6 = vsel %vm3043_vm5, %v419_v13, %v423_v62  ;;  %v581_v34 = vrot.slane %v310_v63, 5  ;;  %v450_v35 = vshrl.u32 %v3145_v8, 16  ;;  %v453_v18 = vshll.u32 %v3145_v8, 16  ;;  %v3199_v62 = vld [vmem:[%s2967_s29 + $0x48] sm:$0xf] }
  0x3f   : > { %722 = vrot.lane.b32.xlu0 %v3071_v2, %s2837_s27  ;;  %v3161_v26 = vcombine.low %v414_v12, %v424_v6  ;;  %v442_v37 = vor.u32 %v441_v5, %v437_v32  ;;  %v447_v40 = vrot.slane %v445_v21, 5  ;;  %v463_v41 = vshrl.u32 %v3150_v15, 16  ;;  %v3170_v2 = vld [vmem:[%s2967_s29 + $0x44] sm:$0x1] }
  0x40   : > { %v580_v43 = vrot.slane %v578_v25, 4  ;;  %v452_v44 = vrot.slane %v450_v35, 4  ;;  %v455_v45 = vrot.slane %v453_v18, 5  ;;  %v459_v39 = vshll.u32 %v3150_v15, 16 }
  0x41   : > { %857 = vrot.lane.b32.xlu1 %v3161_v26, %s2836_s17  ;;  %v572_v48 = vsel %vm3015_vm4, %v2253_v20, %v571_v10  ;;  %v575_v22 = vsel %vm3015_vm4, %v573_v29, %v574_v24  ;;  %v433_v50 = vrot.slane %v432_v31, 4  ;;  %v443_v51 = vrot.slane %v442_v37, 4 }
  0x42   : > { %v456_v52 = vor.u32 %v455_v45, %v452_v44  ;;  %v3181_v53 = vrot.slane %v459_v39, 5  ;;  %v465_v54 = vrot.slane %v463_v41, 4  ;;  %v3183_v23 = vcombine.low %v572_v48, %v575_v22  ;;  %v3267_v22 = vld [vmem:[%s2967_s29 + $0x60] sm:$0xf] }
  0x43   : > { %762 = vrot.lane.b32.xlu0 %v3052_v56, %s2835_s15  ;;  %v579_v56 = vsel %vm3015_vm4, %v2254_v33, %v578_v25  ;;  %v582_v55 = vsel %vm3015_vm4, %v580_v43, %v581_v34  ;;  %v469_v58 = vshll.u32 %v3170_v2, 16  ;;  %v438_v59 = vsel %vm3043_vm5, %v433_v50, %v437_v32  ;;  %v319_v32 = vld [vmem:[%s2967_s29 + $0x5c] sm:$0x1] }
  0x44   : > { %v448_v27 = vsel %vm3043_vm5, %v443_v51, %v447_v40  ;;  %v2255_v60 = vrot.slane %v3145_v8, 9  ;;  %v585_v61 = vrot.slane %v3150_v15, 5  ;;  %v3203_v63 = vcombine.low %v3114_v49, %v3128_v57  ;;  %v3222_v49 = vld [vmem:[%s2967_s29 + $0x54] sm:$0xf] }
  0x45   : > { %802 = vrot.lane.b32.xlu1 %v3161_v26, %s2834_s9  ;;  %v3207_v0 = vcombine.low %v3145_v8, %v3150_v15  ;;  %v3214_v3 = vcombine.low %v579_v56, %v582_v55  ;;  %v457_v4 = vrot.slane %v456_v52, 4  ;;  %v466_v7 = vor.u32 %v465_v54, %v3181_v53  ;;  %v3276_v54 = vld [vmem:[%s2967_s29 + $0x64] sm:$0xf] }
  0x46   : > { %v588_v10 = vrot.slane %v3170_v2, 5  ;;  %v3224_v57 = vcombine.low %v438_v59, %v448_v27  ;;  %v471_v8 = vrot.slane %v469_v58, 5  ;;  %v474_v12 = vshrl.u32 %v3199_v62, 16 }
  0x47   : > { %783 = vrot.lane.b32.xlu0 %v3010_v28, %s2831_s8  ;;  %v2256_v13 = vrot.slane %v3199_v62, 9  ;;  %v3234_v14 = vrot.slane %v585_v61, 4  ;;  %v477_v15 = vshll.u32 %v3199_v62, 16  ;;  %v592_v17 = vrot.slane %v3210_v1, 5 }
  0x48   : > { %v487_v5 = vshrl.u32 %v3210_v1, 16  ;;  %v595_v21 = vrot.slane %v3219_v11, 5  ;;  %v498_v6 = vshrl.u32 %v3222_v49, 16  ;;  %v501_v20 = vshll.u32 %v3222_v49, 16 }
  0x49   : > { %724 = vrot.lane.b32.xlu1 %v3109_v47, %s2837_s27  ;;  %v3232_v47 = vsel %vm3015_vm4, %v2255_v60, %v585_v61  ;;  %v462_v24 = vsel %vm3043_vm5, %v457_v4, %v3181_v53  ;;  %v467_v25 = vrot.slane %v466_v7, 4  ;;  %v593_v29 = vsel %vm3015_vm4, %v2256_v13, %v592_v17  ;;  %v322_v7 = vld [vmem:[%s2967_s29 + $0x68] sm:$0x1] }
  0x4a   : > { %v594_v31 = vrot.slane %v592_v17, 4  ;;  %v3253_v33 = vrot.slane %v474_v12, 4  ;;  %v511_v34 = vshrl.u32 %v3239_v19, 16  ;;  %v500_v35 = vrot.slane %v498_v6, 4 }
  0x4b   : > { %821 = vrot.lane.b32.xlu0 %v3183_v23, %s2833_s30  ;;  %v503_v18 = vrot.slane %v501_v20, 5  ;;  %v3258_v37 = vrot.slane %v477_v15, 5  ;;  %v483_v40 = vshll.u32 %v3210_v1, 16  ;;  %v507_v43 = vshll.u32 %v3239_v19, 16  ;;  %v2570_v20 = vld [vmem:[%s4071_s1 + $0x80] sm:$0xff]  }
  0x4c   : > { %v596_v41 = vsel %vm3015_vm4, %v594_v31, %v595_v21  ;;  %v513_v39 = vrot.slane %v511_v34, 4  ;;  %v517_v48 = vshll.u32 %v319_v32, 16  ;;  %v472_v50 = vsel %vm3043_vm5, %v467_v25, %v471_v8  ;;  %2428 = vmatprep.subr.bf16.mxu1 %v2570_v20 }
  0x4d   : > { %764 = vrot.lane.b32.xlu1 %v3104_v42, %s2835_s15  ;;  %v3264_v44 = vcombine.low %v593_v29, %v596_v41  ;;  %v504_v45 = vor.u32 %v503_v18, %v500_v35  ;;  %v509_v51 = vrot.slane %v507_v43, 5  ;;  %v2257_v52 = vrot.slane %v3222_v49, 9  ;;  %v3312_v43 = vld [vmem:[%s2967_s29 + $0x70] sm:$0xf]  ;;  %2429 = vmatpush3.bf16.msra.mxu1 %v2570_v20 }
  0x4e   : > { %v599_v53 = vrot.slane %v3239_v19, 5  ;;  %v3278_v56 = vrot.slane %v487_v5, 4  ;;  %v519_v58 = vrot.slane %v517_v48, 5  ;;  %v602_v59 = vrot.slane %v319_v32, 5  ;;  %v3303_v32 = vld [vmem:[%s2967_s29 + $0x6c] sm:$0xf] }
  0x4f   : > { %840 = vrot.lane.b32.xlu0 %v3203_v63, %s2832_s13  ;;  %v505_v55 = vrot.slane %v504_v45, 4  ;;  %v514_v27 = vor.u32 %v513_v39, %v509_v51  ;;  %v605_v4 = vshrl.u32 %v3267_v22, 16  ;;  %v3286_v8 = vcombine.low %v462_v24, %v472_v50 }
  0x50   : > { %v600_v60 = vsel %vm3015_vm4, %v2257_v52, %v599_v53  ;;  %v601_v61 = vrot.slane %v599_v53, 4  ;;  %v608_v13 = vshll.u32 %v3267_v22, 16  ;;  %v618_v15 = vshrl.u32 %v3276_v54, 16 }
  0x51   : > { %785 = vrot.lane.b32.xlu1 %v3203_v63, %s2831_s8  ;;  %v510_v12 = vsel %vm3043_vm5, %v505_v55, %v509_v51  ;;  %v515_v17 = vrot.slane %v514_v27, 4  ;;  %v607_v21 = vrot.slane %v605_v4, 4  ;;  %v614_v6 = vshll.u32 %v3276_v54, 16  ;;  %v325_v4 = vld [vmem:[%s2967_s29 + $0x74] sm:$0x1]  ;;  %s3856_s29 = sand.u32 1, %s2805_s19  }
  0x52   : > { %v603_v5 = vsel %vm3015_vm4, %v601_v61, %v602_v59  ;;  %v610_v25 = vrot.slane %v608_v13, 5  ;;  %v620_v29 = vrot.slane %v618_v15, 4  ;;  %v624_v31 = vshll.u32 %v322_v7, 16 }
  0x53   : > { %859 = vrot.lane.b32.xlu0 %v3224_v57, %s2836_s17  ;;  %v3300_v24 = vcombine.low %v600_v60, %v603_v5  ;;  %v520_v34 = vsel %vm3043_vm5, %v515_v17, %v519_v58  ;;  %v616_v35 = vrot.slane %v614_v6, 5  ;;  %v2258_v18 = vrot.slane %v3267_v22, 9  ;;  %v2571_v58 = vld [vmem:[%s4071_s1 + $0x88] sm:$0xff]  }
  0x54   : > { %v633_v41 = vrot.slane %v3276_v54, 5  ;;  %v3314_v45 = vcombine.low %v510_v12, %v520_v34  ;;  %v611_v39 = vor.u32 %v610_v25, %v607_v21  ;;  %v626_v48 = vrot.slane %v624_v31, 5  ;;  %2430 = vmatprep.subr.bf16.mxu1 %v2571_v58 }
  0x55   : > { %823 = vrot.lane.b32.xlu1 %v3214_v3, %s2833_s30  ;;  %v636_v50 = vrot.slane %v322_v7, 5  ;;  %v621_v51 = vor.u32 %v620_v29, %v616_v35  ;;  %v639_v55 = vshrl.u32 %v3303_v32, 16  ;;  %v3324_v59 = vrot.slane %v483_v40, 5  ;;  %2431 = vmatpush3.bf16.msra.mxu1 %v2571_v58  ;;  %v2572_v29 = vld [vmem:[%s4071_s1 + $0x90] sm:$0xff]  }
  0x56   : > { %v634_v52 = vsel %vm3015_vm4, %v2258_v18, %v633_v41  ;;  %v635_v53 = vrot.slane %v633_v41, 4  ;;  %v612_v27 = vrot.slane %v611_v39, 4  ;;  %v642_v60 = vshll.u32 %v3303_v32, 16  ;;  %2432 = vmatprep.subr.bf16.mxu1 %v2572_v29 }
  0x57   : > { %804 = vrot.lane.b32.xlu0 %v3224_v57, %s2834_s9  ;;  %v652_v61 = vshrl.u32 %v3312_v43, 16  ;;  %v622_v7 = vrot.slane %v621_v51, 4  ;;  %v641_v13 = vrot.slane %v639_v55, 4  ;;  %v648_v15 = vshll.u32 %v3312_v43, 16 }
  0x58   : > { %v637_v12 = vsel %vm3015_vm4, %v635_v53, %v636_v50  ;;  %v617_v40 = vsel %vm3043_vm5, %v612_v27, %v616_v35  ;;  %v644_v5 = vrot.slane %v642_v60, 5  ;;  %v658_v25 = vshll.u32 %v325_v4, 16 }
  0x59   : > { %842 = vrot.lane.b32.xlu1 %v3207_v0, %s2832_s13  ;;  %v3336_v17 = vcombine.low %v634_v52, %v637_v12  ;;  %v654_v21 = vrot.slane %v652_v61, 4  ;;  %v627_v6 = vsel %vm3043_vm5, %v622_v7, %v626_v48  ;;  %v650_v20 = vrot.slane %v648_v15, 5  ;;  %2433 = vmatpush3.bf16.msra.mxu1 %v2572_v29 }
  0x5a   : > { %v493_v31 = vshll.u32 %v3219_v11, 16  ;;  %v3351_v34 = vcombine.low %v617_v40, %v627_v6  ;;  %v645_v35 = vor.u32 %v644_v5, %v641_v13  ;;  %v2259_v2 = vrot.slane %v3303_v32, 9 }
  0x5b   : > { %726 = vrot.lane.b32.xlu0 %v3161_v26, %s2837_s27  ;;  %v589_v26 = vsel %vm3015_vm4, %v3234_v14, %v588_v10  ;;  %v655_v10 = vor.u32 %v654_v21, %v650_v20  ;;  %v660_v14 = vrot.slane %v658_v25, 5  ;;  %v667_v18 = vrot.slane %v3312_v43, 5 }
  0x5c   : > { %v670_v41 = vrot.slane %v325_v4, 5  ;;  %v480_v39 = vor.u32 %v3258_v37, %v3253_v33  ;;  %v490_v11 = vor.u32 %v3278_v56, %v3324_v59  ;;  %v646_v48 = vrot.slane %v645_v35, 4  ;;  %v2573_v33 = vld [vmem:[%s4071_s1 + $0x98] sm:$0xff]  }
  0x5d   : > { %861 = vrot.lane.b32.xlu1 %v3286_v8, %s2836_s17  ;;  %v2260_v50 = vcombine.low %v3023_v36, %v3026_v38  ;;  %v656_v51 = vrot.slane %v655_v10, 4  ;;  %v3367_v52 = vsel %vm3015_vm4, %v2259_v2, %v667_v18  ;;  %v669_v53 = vrot.slane %v667_v18, 4  ;;  %2434 = vmatprep.subr.bf16.mxu1 %v2573_v33 }
  0x5e   : > { %v651_v37 = vsel %vm3043_vm5, %v646_v48, %v650_v20  ;;  %v2281_v56 = vcombine.low %v3232_v47, %v589_v26  ;;  %v495_v55 = vrot.slane %v493_v31, 5  ;;  %v481_v60 = vrot.slane %v480_v39, 4  ;;  %2435 = vmatpush3.bf16.msra.mxu1 %v2573_v33  ;;  %v2574_v47 = vld [vmem:[%s4071_s1 + $0xa0] ss:$0 sps:$4 sm:$0x33]  }
  0x5f   : > { %766 = vrot.lane.b32.xlu0 %v3183_v23, %s2835_s15  ;;  %v661_v58 = vsel %vm3043_vm5, %v656_v51, %v660_v14  ;;  %v3381_v27 = vsel %vm3015_vm4, %v669_v53, %v670_v41  ;;  %v491_v61 = vrot.slane %v490_v11, 4  ;;  %v3393_v30 = vcombine.low %v3199_v62, %v3210_v1  ;;  %2454 = vmatprep.subr.msk.bf16.mxu1 %vm1238_vm6, %v2574_v47 }
  0x60   : > { %v2288_v4 = vcombine.low %v651_v37, %v661_v58  ;;  %v2289_v7 = vcombine.low %v3367_v52, %v3381_v27  ;;  %v1240_v12 = vsel %vm1238_vm6, %v2574_v47, 0  ;;  %v486_v13 = vsel %vm3043_vm5, %v481_v60, %v3324_v59 }
  0x61   : > { %806 = vrot.lane.b32.xlu1 %v3286_v8, %s2834_s9  ;;  %v3414_v46 = vcombine.low %v3222_v49, %v3239_v19  ;;  %v2287_v1 = vcombine.low %v3303_v32, %v3312_v43 }
  0x62   : > { %2437 = vmatpush3.bf16.msra.mxu1 %v1240_v12 }
  0x63   : > { %787 = vrot.lane.b32.xlu0 %v3207_v0, %s2831_s8 }
  0x65   : > { %728 = vrot.lane.b32.xlu1 %v3224_v57, %s2837_s27  ;;  %v496_v57 = vsel %vm3043_vm5, %v491_v61, %v495_v55 }
  0x66   : > { %v2274_v15 = vcombine.low %v486_v13, %v496_v57 }
  0x67   : > { %825 = vrot.lane.b32.xlu0 %v2281_v56, %s2833_s30 }
  0x69   : > { %768 = vrot.lane.b32.xlu1 %v3214_v3, %s2835_s15 }
  0x6b   : > { %844 = vrot.lane.b32.xlu0 %v3393_v30, %s2832_s13 }
  0x6d   : > { %874 = vrot.lane.b32.xlu1 %v3104_v42, %s2838_s10  ;;  %v2284_v42 = vcombine.low %v3267_v22, %v3276_v54 }
  0x6f   : > { %863 = vrot.lane.b32.xlu0 %v2274_v15, %s2836_s17 }
  0x71   : > { %808 = vrot.lane.b32.xlu1 %v2274_v15, %s2834_s9 }
  0x73   : > { %789 = vrot.lane.b32.xlu0 %v3393_v30, %s2831_s8 }
  0x75   : > { %827 = vrot.lane.b32.xlu1 %v3264_v44, %s2833_s30 }
  0x77   : > { %876 = vrot.lane.b32.xlu0 %v3183_v23, %s2838_s10 }
  0x79   : > { %846 = vrot.lane.b32.xlu1 %v3414_v46, %s2832_s13 }
  0x7b   : > { %730 = vrot.lane.b32.xlu0 %v3286_v8, %s2837_s27 }
  0x7d   : > { %865 = vrot.lane.b32.xlu1 %v3314_v45, %s2836_s17 }
  0x7f   : > { %770 = vrot.lane.b32.xlu0 %v2281_v56, %s2835_s15 }
  0x81   : > { %791 = vrot.lane.b32.xlu1 %v3414_v46, %s2831_s8 }
  0x83   : > { %878 = vrot.lane.b32.xlu0 %v3214_v3, %s2838_s10 }
  0x85   : > { %880 = vrot.lane.b32.xlu1 %v2281_v56, %s2838_s10 }
  0x87   : > { %810 = vrot.lane.b32.xlu0 %v3314_v45, %s2834_s9 }
  0x89   : > { %732 = vrot.lane.b32.xlu1 %v2274_v15, %s2837_s27 }
  0x8b   : > { %829 = vrot.lane.b32.xlu0 %v3300_v24, %s2833_s30 }
  0x8d   : > { %772 = vrot.lane.b32.xlu1 %v3264_v44, %s2835_s15 }
  0x8f   : > { %848 = vrot.lane.b32.xlu0 %v2284_v42, %s2832_s13 }
  0x91   : > { %882 = vrot.lane.b32.xlu1 %v3264_v44, %s2838_s10 }
  0x93   : > { %867 = vrot.lane.b32.xlu0 %v3351_v34, %s2836_s17 }
  0x95   : > { %812 = vrot.lane.b32.xlu1 %v3351_v34, %s2834_s9  ;;  %s2245_s9 = sshll.u32 %s2948_s12, 5 }
  0x97   : > { %793 = vrot.lane.b32.xlu0 %v2284_v42, %s2831_s8  ;;  %v782_v23 = vpop.permute.xlu1 %781  ;;  %s2244_s8 = sshll.u32 %s4099_s14, 1 }
  0x98   : > { %v780_v62 = vpop.permute.xlu0 %779 }
  0x99   : > { %831 = vrot.lane.b32.xlu1 %v3336_v17, %s2833_s30  ;;  %s285_s30 = sadd.s32 %s2245_s9, %s2244_s8  ;;  %s2840_s9 = smov 64  }
  0x9a   : > { %s2349_s8 = sshll.u32 %s2813_s21, 4 }
  0x9b   : > { %884 = vrot.lane.b32.xlu0 %v3300_v24, %s2838_s10  ;;  %v839_v3 = vpop.permute.xlu1 %838 }
  0x9c   : > { %v837_v49 = vpop.permute.xlu0 %836 }
  0x9d   : > { %850 = vrot.lane.b32.xlu1 %v2287_v1, %s2832_s13  ;;  %s2246_s13 = sshll.u32 %s285_s30, 3  ;;  %s2340_s30 = sshll.u32 %s2817_s22, 5 }
  0x9f   : > { %734 = vrot.lane.b32.xlu0 %v3314_v45, %s2837_s27  ;;  %s3470_s27 = scalar_lea.vmem %s4073_s3, %s2246_s13  ;;  %s3921_s13 = sadd.s32 %s2349_s8, %s2340_s30 }
  0xa0   : > { %v818_v19 = vpop.permute.xlu1 %817  ;;  %v1548_v43 = vld [vmem:[%s3470_s27] sm:$0xff]  ;;  %s2341_s12 = sshll.u32 %s3921_s13, 7 }
  0xa1   : > { %869 = vrot.lane.b32.xlu1 %v2288_v4, %s2836_s17 }
  0xa2   : > { %v799_v44 = vpop.permute.xlu0 %798 }
  0xa3   : > { %774 = vrot.lane.b32.xlu0 %v3300_v24, %s2835_s15  ;;  %v959_v22 = vsel %vm957_vm7, %v780_v62, %v799_v44  ;;  %v1549_v24 = vld [vmem:[%s3470_s27 + $0x8] sm:$0xff]  ;;  %s2066_s15 = scalar_lea.sflag [#allocation5], %s3856_s29 }
  0xa4   : > { %v976_v54 = vsel %vm974_vm8, %v959_v22, %v818_v19  ;;  %v761_v8 = vpop.permute.xlu1 %760 }
  0xa5   : > { %888 = vrot.lane.b32.xlu1 %v2289_v7, %s2838_s10  ;;  %v993_v32 = vsel %vm991_vm9, %v976_v54, %v837_v49 }
  0xa7   : > { %886 = vrot.lane.b32.xlu0 %v3336_v17, %s2838_s10 }
  0xa8   : > { %v820_v59 = vpop.permute.xlu1 %819 }
  0xa9   : > { %v3477_v45 = vpop.permute.xlu0 %855  ;;  %1582 = vrot.lane.b32.xlu1 %v1549_v24, %s2838_s10 }
  0xaa   : > { %v1010_v40 = vsel %vm1008_vm10, %v993_v32, %v3477_v45 }
  0xab   : > { %1274 = vmatprep.mubr.bf16.mxu0 %v1010_v40  ;;  %1580 = vrot.lane.b32.xlu0 %v1548_v43, %s2838_s10 }
  0xad   : > { %v801_v5 = vpop.permute.xlu0 %800 }
  0xae   : > { %v961_v21 = vsel %vm957_vm7, %v782_v23, %v801_v5 }
  0xaf   : > { %v721_v17 = vpop.permute.xlu1 %720  ;;  %v978_v26 = vsel %vm974_vm8, %v961_v21, %v820_v59 }
  0xb0   : > { %v893_v6 = vsel %vm890_vm11, %v2260_v50, %v721_v17  ;;  %v995_v34 = vsel %vm991_vm9, %v978_v26, %v839_v3 }
  0xb1   : > { %v723_v20 = vpop.permute.xlu0 %722  ;;  %v917_v25 = vsel %vm915_vm12, %v893_v6, %v761_v8 }
  0xb2   : > { %v934_v29 = vsel %vm932_vm13, %v917_v25, %v780_v62  ;;  %v896_v36 = vsel %vm890_vm11, %v2990_v16, %v723_v20 }
  0xb3   : > { %1275 = vmatmul.mubr.bf16.vlgmr.msra.gmra.mrb[0].mxu0 %v934_v29  ;;  %v3491_v31 = vpop.permute.xlu1 %857 }
  0xb4   : > { %v1013_v35 = vsel %vm1008_vm10, %v995_v34, %v3491_v31 }
  0xb5   : > { %v763_v2 = vpop.permute.xlu0 %762  ;;  %1282 = vmatprep.mubr.bf16.mxu0 %v1013_v35 }
  0xb6   : > { %v919_v38 = vsel %vm915_vm12, %v896_v36, %v763_v2 }
  0xb7   : > { %v803_v10 = vpop.permute.xlu1 %802  ;;  %v937_v18 = vsel %vm932_vm13, %v919_v38, %v782_v23 }
  0xb9   : > { %v784_v14 = vpop.permute.xlu0 %783 }
  0xba   : > { %v963_v51 = vsel %vm957_vm7, %v784_v14, %v803_v10 }
  0xbb   : > { %1283 = vmatmul.mubr.bf16.gmra.mrb[4].mxu0 %v937_v18  ;;  %v725_v41 = vpop.permute.xlu1 %724 }
  0xbc   : > { %v899_v48 = vsel %vm890_vm11, %v2982_v9, %v725_v41 }
  0xbd   : > { %v822_v39 = vpop.permute.xlu0 %821 }
  0xbe   : > { %v980_v53 = vsel %vm974_vm8, %v963_v51, %v822_v39 }
  0xbf   : > { %v765_v11 = vpop.permute.xlu1 %764 }
  0xc0   : > { %v921_v16 = vsel %vm915_vm12, %v899_v48, %v765_v11 }
  0xc1   : > { %v841_v50 = vpop.permute.xlu0 %840  ;;  %v940_v55 = vsel %vm932_vm13, %v921_v16, %v784_v14 }
  0xc2   : > { %v997_v33 = vsel %vm991_vm9, %v980_v53, %v841_v50 }
  0xc3   : > { %v786_v52 = vpop.permute.xlu1 %785 }
  0xc5   : > { %v3506_v37 = vpop.permute.xlu0 %859 }
  0xc6   : > { %v1016_v56 = vsel %vm1008_vm10, %v997_v33, %v3506_v37 }
  0xc7   : > { %1290 = vmatprep.mubr.bf16.mxu0 %v1016_v56  ;;  %v824_v58 = vpop.permute.xlu1 %823 }
  0xc8   : > { %1291 = vmatmul.mubr.bf16.gmra.mrb[8].mxu0 %v940_v55 }
  0xc9   : > { %v805_v9 = vpop.permute.xlu0 %804 }
  0xca   : > { %v965_v27 = vsel %vm957_vm7, %v786_v52, %v805_v9 }
  0xcb   : > { %v843_v60 = vpop.permute.xlu1 %842  ;;  %v982_v61 = vsel %vm974_vm8, %v965_v27, %v824_v58 }
  0xcc   : > { %v999_v7 = vsel %vm991_vm9, %v982_v61, %v843_v60 }
  0xcd   : > { %v727_v4 = vpop.permute.xlu0 %726 }
  0xce   : > { %v902_v13 = vsel %vm890_vm11, %v3010_v28, %v727_v4 }
  0xcf   : > { %v862_v47 = vpop.permute.xlu1 %861 }
  0xd0   : > { %v1019_v12 = vsel %vm1008_vm10, %v999_v7, %v862_v47 }
  0xd1   : > { %v767_v57 = vpop.permute.xlu0 %766  ;;  %1298 = vmatprep.mubr.bf16.mxu0 %v1019_v12 }
  0xd2   : > { %v923_v15 = vsel %vm915_vm12, %v902_v13, %v767_v57 }
  0xd3   : > { %v943_v42 = vsel %vm932_vm13, %v923_v15, %v786_v52  ;;  %v807_v23 = vpop.permute.xlu1 %806 }
  0xd4   : > { %1299 = vmatmul.mubr.bf16.gmra.mrb[12].mxu0 %v943_v42 }
  0xd5   : > { %v788_v62 = vpop.permute.xlu0 %787 }
  0xd6   : > { %v967_v28 = vsel %vm957_vm7, %v788_v62, %v807_v23 }
  0xd7   : > { %v729_v1 = vpop.permute.xlu1 %728 }
  0xd8   : > { %v905_v19 = vsel %vm890_vm11, %v3203_v63, %v729_v1 }
  0xd9   : > { %v826_v3 = vpop.permute.xlu0 %825 }
  0xda   : > { %v984_v54 = vsel %vm974_vm8, %v967_v28, %v826_v3 }
  0xdb   : > { %v769_v49 = vpop.permute.xlu1 %768 }
  0xdc   : > { %v925_v8 = vsel %vm915_vm12, %v905_v19, %v769_v49 }
  0xdd   : > { %v845_v44 = vpop.permute.xlu0 %844  ;;  %v946_v59 = vsel %vm932_vm13, %v925_v8, %v788_v62 }
  0xde   : > { %v1001_v32 = vsel %vm991_vm9, %v984_v54, %v845_v44 }
  0xdf   : > { %v875_v22 = vpop.permute.xlu1 %874 }
  0xe0   : > { %v1035_v24 = vsel %vm1033_vm14, %v3477_v45, %v875_v22 }
  0xe1   : > { %v864_v43 = vpop.permute.xlu0 %863  ;;  %2438 = vmatprep.mubr.msk.bf16.mxu1 %vm1221_vm15, %v1035_v24 }
  0xe2   : > { %v1022_v63 = vsel %vm1008_vm10, %v1001_v32, %v864_v43 }
  0xe3   : > { %1306 = vmatprep.mubr.bf16.mxu0 %v1022_v63  ;;  %v809_v40 = vpop.permute.xlu1 %808 }
  0xe4   : > { %1307 = vmatmul.mubr.bf16.gmra.mrb[16].mxu0 %v946_v59 }
  0xe5   : > { %v790_v5 = vpop.permute.xlu0 %789 }
  0xe6   : > { %v969_v6 = vsel %vm957_vm7, %v790_v5, %v809_v40 }
  0xe7   : > { %v828_v21 = vpop.permute.xlu1 %827 }
  0xe8   : > { %v986_v25 = vsel %vm974_vm8, %v969_v6, %v828_v21 }
  0xe9   : > { %v877_v17 = vpop.permute.xlu0 %876 }
  0xea   : > { %v1037_v26 = vsel %vm1033_vm14, %v3491_v31, %v877_v17 }
  0xeb   : > { %2439 = vmatmul.mubr.msk.bf16.vlgmr.msra.gmra.mrb[0].mxu1 %vm1221_vm15, %v1037_v26  ;;  %v847_v45 = vpop.permute.xlu1 %846 }
  0xec   : > { %v1003_v29 = vsel %vm991_vm9, %v986_v25, %v847_v45 }
  0xed   : > { %v731_v20 = vpop.permute.xlu0 %730 }
  0xee   : > { %v908_v2 = vsel %vm890_vm11, %v3207_v0, %v731_v20 }
  0xef   : > { %v866_v34 = vpop.permute.xlu1 %865 }
  0xf0   : > { %v1025_v35 = vsel %vm1008_vm10, %v1003_v29, %v866_v34 }
  0xf1   : > { %v771_v36 = vpop.permute.xlu0 %770  ;;  %1314 = vmatprep.mubr.bf16.mxu0 %v1025_v35 }
  0xf2   : > { %v927_v31 = vsel %vm915_vm12, %v908_v2, %v771_v36 }
  0xf3   : > { %v949_v38 = vsel %vm932_vm13, %v927_v31, %v790_v5  ;;  %v792_v10 = vpop.permute.xlu1 %791 }
  0xf4   : > { %1315 = vmatmul.mubr.bf16.gmra.mrb[20].mxu0 %v949_v38 }
  0xf5   : > { %v879_v14 = vpop.permute.xlu0 %878 }
  0xf6   : > { %v1039_v18 = vsel %vm1033_vm14, %v3506_v37, %v879_v14 }
  0xf7   : > { %2442 = vmatprep.mubr.msk.bf16.mxu1 %vm1221_vm15, %v1039_v18  ;;  %v881_v41 = vpop.permute.xlu1 %880 }
  0xf8   : > { %v1041_v39 = vsel %vm1033_vm14, %v862_v47, %v881_v41 }
  0xf9   : > { %v811_v11 = vpop.permute.xlu0 %810  ;;  %2443 = vmatmul.mubr.msk.bf16.gmra.mrb[4].mxu1 %vm1221_vm15, %v1041_v39 }
  0xfa   : > { %v971_v53 = vsel %vm957_vm7, %v792_v10, %v811_v11 }
  0xfb   : > { %v733_v0 = vpop.permute.xlu1 %732 }
  0xfc   : > { %v911_v51 = vsel %vm890_vm11, %v3393_v30, %v733_v0  ;;  %v3575_v0 = vld [vmem:[%s4072_s2] ss:$0 sm:$0xff] }
  0xfd   : > { %v830_v48 = vpop.permute.xlu0 %829 }
  0xfe   : > { %v988_v33 = vsel %vm974_vm8, %v971_v53, %v830_v48 }
  0xff   : > { %v773_v50 = vpop.permute.xlu1 %772 }
 0x100   : > { %v929_v37 = vsel %vm915_vm12, %v911_v51, %v773_v50 }
 0x101   : > { %v849_v52 = vpop.permute.xlu0 %848  ;;  %v952_v30 = vsel %vm932_vm13, %v929_v37, %v792_v10 }
 0x102   : > { %v1005_v55 = vsel %vm991_vm9, %v988_v33, %v849_v52 }
 0x103   : > { %v883_v16 = vpop.permute.xlu1 %882 }
 0x104   : > { %v1043_v56 = vsel %vm1033_vm14, %v864_v43, %v883_v16 }
 0x105   : > { %v868_v58 = vpop.permute.xlu0 %867  ;;  %2446 = vmatprep.mubr.msk.bf16.mxu1 %vm1221_vm15, %v1043_v56 }
 0x106   : > { %v1028_v9 = vsel %vm1008_vm10, %v1005_v55, %v868_v58 }
 0x107   : > { %1322 = vmatprep.mubr.bf16.mxu0 %v1028_v9  ;;  %v813_v27 = vpop.permute.xlu1 %812 }
 0x108   : > { %1323 = vmatmul.mubr.bf16.gmra.mrb[24].mxu0 %v952_v30 }
 0x109   : > { %v794_v60 = vpop.permute.xlu0 %793 }
 0x10a   : > { %v973_v12 = vsel %vm957_vm7, %v794_v60, %v813_v27 }
 0x10b   : > { %v832_v61 = vpop.permute.xlu1 %831 }
 0x10c   : > { %v990_v57 = vsel %vm974_vm8, %v973_v12, %v832_v61 }
 0x10d   : > { %v885_v4 = vpop.permute.xlu0 %884 }
 0x10e   : > { %v1045_v7 = vsel %vm1033_vm14, %v866_v34, %v885_v4 }
 0x10f   : > { %2447 = vmatmul.mubr.msk.bf16.gmra.mrb[8].mxu1 %vm1221_vm15, %v1045_v7  ;;  %v851_v47 = vpop.permute.xlu1 %850 }
 0x110   : > { %v1007_v15 = vsel %vm991_vm9, %v990_v57, %v851_v47 }
 0x111   : > { %v735_v13 = vpop.permute.xlu0 %734 }
 0x112   : > { %v914_v62 = vsel %vm890_vm11, %v3414_v46, %v735_v13 }
 0x113   : > { %v870_v42 = vpop.permute.xlu1 %869 }
 0x114   : > { %v1031_v23 = vsel %vm1008_vm10, %v1007_v15, %v870_v42 }
 0x115   : > { %v775_v1 = vpop.permute.xlu0 %774  ;;  %1330 = vmatprep.mubr.bf16.mxu0 %v1031_v23 }
 0x116   : > { %v931_v3 = vsel %vm915_vm12, %v914_v62, %v775_v1 }
 0x117   : > { %v955_v49 = vsel %vm932_vm13, %v931_v3, %v794_v60  ;;  %v889_v19 = vpop.permute.xlu1 %888 }
 0x118   : > { %1331 = vmatmul.mubr.bf16.gmra.mrb[28].mxu0 %v955_v49  ;;  %v1049_v22 = vsel %vm1033_vm14, %v870_v42, %v889_v19 }
 0x119   : > { %v887_v44 = vpop.permute.xlu0 %886 }
 0x11a   : > { %v1047_v28 = vsel %vm1033_vm14, %v868_v58, %v887_v44 }
 0x11b   : > { %2450 = vmatprep.mubr.msk.bf16.mxu1 %vm1221_vm15, %v1047_v28 }
 0x11c   : > { %2451 = vmatmul.mubr.msk.bf16.gmra.mrb[12].mxu1 %vm1221_vm15, %v1049_v22 }
 0x186   : > { %v2367_v54 = vpop.f32.mrb[0].mxu0 }
 0x187   : > { %v2368_v8 = vpop.f32.mrb[1].mxu0 }
 0x188   : > { %v2369_v46 = vadd.f32 %v2368_v8, %v2367_v54  ;;  %v2370_v24 = vpop.f32.mrb[2].mxu0 }
 0x189   : > { %v2371_v32 = vpop.f32.mrb[3].mxu0 }
 0x18a   : > { %v2372_v43 = vadd.f32 %v2371_v32, %v2370_v24  ;;  %v1277_v51 = vadd.f32 %v2369_v46, %v3575_v0 }
 0x18c   : > { %v1280_v56 = vadd.f32 %v2372_v43, %v3575_v0 }
 0x18e   : > { %v2373_v63 = vpop.f32.mrb[4].mxu0 }
 0x18f   : > { %v2374_v59 = vpop.f32.mrb[5].mxu0 }
 0x190   : > { %v2375_v40 = vadd.f32 %v2374_v59, %v2373_v63  ;;  %v2376_v5 = vpop.f32.mrb[6].mxu0 }
 0x191   : > { %v2377_v21 = vpop.f32.mrb[7].mxu0 }
 0x192   : > { %v2378_v17 = vadd.f32 %v2377_v21, %v2376_v5  ;;  %v1285_v48 = vadd.f32 %v2375_v40, %v3575_v0 }
 0x194   : > { %v1288_v16 = vadd.f32 %v2378_v17, %v3575_v0 }
 0x19b   : > { %v2379_v26 = vpop.f32.mrb[8].mxu0 }
 0x19c   : > { %v2380_v45 = vpop.f32.mrb[9].mxu0 }
 0x19d   : > { %v2381_v6 = vadd.f32 %v2380_v45, %v2379_v26  ;;  %v2382_v20 = vpop.f32.mrb[10].mxu0 }
 0x19e   : > { %v2383_v25 = vpop.f32.mrb[11].mxu0 }
 0x19f   : > { %v2384_v29 = vadd.f32 %v2383_v25, %v2382_v20  ;;  %v1293_v57 = vadd.f32 %v2381_v6, %v3575_v0 }
 0x1a1   : > { %v1296_v3 = vadd.f32 %v2384_v29, %v3575_v0 }
 0x1a7   : > { %v2385_v34 = vpop.f32.mrb[12].mxu0 }
 0x1a8   : > { %v2386_v35 = vpop.f32.mrb[13].mxu0 }
 0x1a9   : > { %v2387_v2 = vadd.f32 %v2386_v35, %v2385_v34  ;;  %v2388_v36 = vpop.f32.mrb[14].mxu0 }
 0x1aa   : > { %v2389_v31 = vpop.f32.mrb[15].mxu0 }
 0x1ab   : > { %v2390_v38 = vadd.f32 %v2389_v31, %v2388_v36  ;;  %v1301_v47 = vadd.f32 %v2387_v2, %v3575_v0 }
 0x1ad   : > { %v1304_v23 = vadd.f32 %v2390_v38, %v3575_v0 }
 0x1b7   : > { %v2391_v10 = vpop.f32.mrb[16].mxu0 }
 0x1b8   : > { %v2392_v14 = vpop.f32.mrb[17].mxu0 }
 0x1b9   : > { %v2393_v18 = vadd.f32 %v2392_v14, %v2391_v10  ;;  %v2394_v41 = vpop.f32.mrb[18].mxu0 }
 0x1ba   : > { %v2395_v39 = vpop.f32.mrb[19].mxu0 }
 0x1bb   : > { %v3570_v11 = vadd.f32 %v2395_v39, %v2394_v41  ;;  %v1309_v21 = vadd.f32 %v2393_v18, %v3575_v0 }
 0x1bd   : > { %v1312_v34 = vadd.f32 %v3570_v11, %v3575_v0 }
 0x1be   : > { %v2440_v50 = vpop.f32.mrb[0].mxu1 }
 0x1bf   : > { %v3579_v52 = vadd.f32 %v2440_v50, %v1285_v48  ;;  %v1373_v53 = vpop.f32.mrb[1].mxu1 }
 0x1c0   : > { %v3582_v33 = vadd.f32 %v1373_v53, %v1277_v51  ;;  %v2441_v37 = vpop.f32.mrb[2].mxu1 }
 0x1c1   : > { %v3585_v55 = vadd.f32 %v2441_v37, %v1288_v16  ;;  %v1376_v58 = vpop.f32.mrb[3].mxu1 }
 0x1c2   : > { %2575 = vtanh.f32 %v3582_v33  ;;  %v3588_v9 = vadd.f32 %v1376_v58, %v1280_v56 }
 0x1c3   : > { %2577 = vtanh.f32 %v3579_v52 }
 0x1c4   : > { %2579 = vtanh.f32 %v3588_v9 }
 0x1c5   : > { %2581 = vtanh.f32 %v3585_v55 }
 0x1c7   : > { %v2397_v30 = vpop.f32.mrb[20].mxu0 }
 0x1c8   : > { %v2398_v27 = vpop.f32.mrb[21].mxu0 }
 0x1c9   : > { %v2399_v60 = vadd.f32 %v2398_v27, %v2397_v30  ;;  %v2400_v61 = vpop.f32.mrb[22].mxu0 }
 0x1ca   : > { %v2401_v4 = vpop.f32.mrb[23].mxu0 }
 0x1cb   : > { %v2402_v7 = vadd.f32 %v2401_v4, %v2400_v61  ;;  %v1317_v40 = vadd.f32 %v2399_v60, %v3575_v0 }
 0x1cc   : > { %v2576_v12 = vpop.eup %2575  ;;  %v2444_v13 = vpop.f32.mrb[4].mxu1 }
 0x1cd   : > { %1660 = vrot.lane.b32.xlu0 %v2576_v12, %s2838_s10  ;;  %v3596_v15 = vadd.f32 %v2444_v13, %v1301_v47  ;;  %v1389_v42 = vpop.f32.mrb[5].mxu1  ;;  %v2578_v44 = vpop.eup %2577  ;;  %v1320_v6 = vadd.f32 %v2402_v7, %v3575_v0 }
 0x1ce   : > { %v3599_v62 = vadd.f32 %v1389_v42, %v1293_v57  ;;  %v2445_v1 = vpop.f32.mrb[6].mxu1  ;;  %v2580_v22 = vpop.eup %2579  ;;  %v1550_v57 = vld [vmem:[%s3470_s27 + $0x10] sm:$0xff] }
 0x1cf   : > { %v3602_v49 = vadd.f32 %v2445_v1, %v1304_v23  ;;  %v1392_v19 = vpop.f32.mrb[7].mxu1  ;;  %1662 = vrot.lane.b32.xlu1 %v2580_v22, %s2838_s10  ;;  %v2582_v54 = vpop.eup %2581  ;;  %v1551_v23 = vld [vmem:[%s3470_s27 + $0x18] sm:$0xff]  ;;  %v1552_v1 = vld [vmem:[%s3470_s27 + $0x20] sm:$0xff] }
 0x1d0   : > { %v3604_v28 = vadd.f32 %v1392_v19, %v1296_v3  ;;  %2583 = vtanh.f32 %v3599_v62  ;;  %v1553_v3 = vld [vmem:[%s3470_s27 + $0x28] sm:$0xff]  ;;  %v1554_v19 = vld [vmem:[%s3470_s27 + $0x30] sm:$0xff]  ;;  %v1556_v22 = vld [vmem:[%s3470_s27 + $0x40] sm:$0xff] }
 0x1d1   : > { %1664 = vrot.lane.b32.xlu0 %v2578_v44, %s2838_s10  ;;  %2585 = vtanh.f32 %v3596_v15  ;;  %v1555_v44 = vld [vmem:[%s3470_s27 + $0x38] sm:$0xff] }
 0x1d2   : > { %2587 = vtanh.f32 %v3604_v28 }
 0x1d3   : > { %1666 = vrot.lane.b32.xlu1 %v2582_v54, %s2838_s10  ;;  %2589 = vtanh.f32 %v3602_v49  ;;  %v1557_v54 = vld [vmem:[%s3470_s27 + $0x48] sm:$0xff] }
 0x1da   : > { %v2584_v59 = vpop.eup %2583 }
 0x1db   : > { %v2403_v8 = vpop.f32.mrb[24].mxu0  ;;  %1668 = vrot.lane.b32.xlu0 %v2584_v59, %s2838_s10  ;;  %v2586_v17 = vpop.eup %2585  ;;  %v2322_v59 = vmul.f32 -1.442695, %v3579_v52  ;;  %v2324_v52 = vmul.f32 -1.442695, %v3599_v62 }
 0x1dc   : > { %v2404_v46 = vpop.f32.mrb[25].mxu0  ;;  %v2588_v20 = vpop.eup %2587 }
 0x1dd   : > { %v2405_v24 = vadd.f32 %v2404_v46, %v2403_v8  ;;  %v2406_v32 = vpop.f32.mrb[26].mxu0  ;;  %1670 = vrot.lane.b32.xlu1 %v2588_v20, %s2838_s10  ;;  %v2590_v31 = vpop.eup %2589  ;;  %v1558_v8 = vld [vmem:[%s3470_s27 + $0x50] sm:$0xff]  ;;  %v1559_v46 = vld [vmem:[%s3470_s27 + $0x58] sm:$0xff] }
 0x1de   : > { %v2407_v43 = vpop.f32.mrb[27].mxu0 }
 0x1df   : > { %v2408_v63 = vadd.f32 %v2407_v43, %v2406_v32  ;;  %1672 = vrot.lane.b32.xlu0 %v2586_v17, %s2838_s10  ;;  %v1325_v50 = vadd.f32 %v2405_v24, %v3575_v0  ;;  %v1560_v24 = vld [vmem:[%s3470_s27 + $0x60] sm:$0xff]  ;;  %v2320_v32 = vmul.f32 -1.442695, %v3582_v33  ;;  %v1561_v43 = vld [vmem:[%s3470_s27 + $0x68] sm:$0xff]  ;;  %v2323_v33 = vmul.f32 -1.442695, %v3585_v55 }
 0x1e1   : > { %1674 = vrot.lane.b32.xlu1 %v2590_v31, %s2838_s10  ;;  %v1328_v58 = vadd.f32 %v2408_v63, %v3575_v0  ;;  %v1562_v63 = vld [vmem:[%s3470_s27 + $0x70] sm:$0xff]  ;;  %v3693_v31 = vpop.permute.xlu0 %1580 }
 0x1e2   : > { %v2448_v5 = vpop.f32.mrb[8].mxu1 }
 0x1e3   : > { %v3616_v26 = vadd.f32 %v2448_v5, %v1317_v40  ;;  %v1405_v45 = vpop.f32.mrb[9].mxu1  ;;  %v2321_v40 = vmul.f32 -1.442695, %v3588_v9  ;;  %v1563_v5 = vld [vmem:[%s3470_s27 + $0x78] sm:$0xff]  ;;  %s3936_s27 = scalar_lea.hbm %s4075_s5, %s2341_s12 }
 0x1e4   : > { %v3619_v25 = vadd.f32 %v1405_v45, %v1309_v21  ;;  %v2449_v29 = vpop.f32.mrb[10].mxu1 }
 0x1e5   : > { %v3625_v35 = vadd.f32 %v2449_v29, %v1320_v6  ;;  %v1408_v2 = vpop.f32.mrb[11].mxu1  ;;  %v2326_v29 = vmul.f32 -1.442695, %v3596_v15 }
 0x1e6   : > { %v3627_v36 = vadd.f32 %v1408_v2, %v1312_v34  ;;  %2591 = vtanh.f32 %v3619_v25  ;;  %v2325_v2 = vmul.f32 -1.442695, %v3604_v28 }
 0x1e7   : > { %2593 = vtanh.f32 %v3616_v26 }
 0x1e8   : > { %2595 = vtanh.f32 %v3627_v36 }
 0x1e9   : > { %2597 = vtanh.f32 %v3625_v35 }
 0x1eb   : > { %v2409_v38 = vpop.f32.mrb[28].mxu0 }
 0x1ec   : > { %v2410_v10 = vpop.f32.mrb[29].mxu0 }
 0x1ed   : > { %v2411_v14 = vadd.f32 %v2410_v10, %v2409_v38  ;;  %v2412_v18 = vpop.f32.mrb[30].mxu0  ;;  %v2327_v38 = vmul.f32 -1.442695, %v3602_v49 }
 0x1ee   : > { %v2413_v41 = vpop.f32.mrb[31].mxu0 }
 0x1ef   : > { %v2414_v39 = vadd.f32 %v2413_v41, %v2412_v18  ;;  %v1333_v11 = vadd.f32 %v2411_v14, %v3575_v0  ;;  %v2452_v48 = vpop.f32.mrb[12].mxu1  ;;  %v3699_v14 = vpop.permute.xlu1 %1582 }
 0x1f0   : > { %v1421_v51 = vpop.f32.mrb[13].mxu1  ;;  %v2592_v27 = vpop.eup %2591 }
 0x1f1   : > { %v3636_v53 = vadd.f32 %v2452_v48, %v1333_v11  ;;  %v3638_v16 = vadd.f32 %v1421_v51, %v1325_v50  ;;  %v1336_v37 = vadd.f32 %v2414_v39, %v3575_v0  ;;  %v2453_v56 = vpop.f32.mrb[14].mxu1  ;;  %1676 = vrot.lane.b32.xlu0 %v2592_v27, %s2838_s10  ;;  %v2594_v4 = vpop.eup %2593 }
 0x1f2   : > { %v1424_v30 = vpop.f32.mrb[15].mxu1  ;;  %v2596_v7 = vpop.eup %2595 }
 0x1f3   : > { %v3643_v60 = vadd.f32 %v2453_v56, %v1336_v37  ;;  %v3645_v61 = vadd.f32 %v1424_v30, %v1328_v58  ;;  %1678 = vrot.lane.b32.xlu1 %v2596_v7, %s2838_s10  ;;  %2599 = vtanh.f32 %v3638_v16  ;;  %v2598_v47 = vpop.eup %2597  ;;  %v2328_v37 = vmul.f32 -1.442695, %v3619_v25 }
 0x1f4   : > { %2601 = vtanh.f32 %v3636_v53  ;;  %v2330_v30 = vmul.f32 -1.442695, %v3616_v26  ;;  %v2331_v26 = vmul.f32 -1.442695, %v3625_v35 }
 0x1f5   : > { %1680 = vrot.lane.b32.xlu0 %v2594_v4, %s2838_s10  ;;  %2603 = vtanh.f32 %v3645_v61 }
 0x1f6   : > { %2605 = vtanh.f32 %v3643_v60 }
 0x1f7   : > { %1682 = vrot.lane.b32.xlu1 %v2598_v47, %s2838_s10  ;;  %2607 = vpow2.f32 %v2320_v32  ;;  %v2334_v32 = vmul.f32 -1.442695, %v3636_v53 }
 0x1f8   : > { %2609 = vpow2.f32 %v2322_v59 }
 0x1f9   : > { %2611 = vpow2.f32 %v2321_v40 }
 0x1fa   : > { %2613 = vpow2.f32 %v2323_v33  ;;  %v2335_v33 = vmul.f32 -1.442695, %v3643_v60 }
 0x1fd   : > { %v2600_v0 = vpop.eup %2599 }
 0x1fe   : > { %1684 = vrot.lane.b32.xlu0 %v2600_v0, %s2838_s10  ;;  %v2602_v12 = vpop.eup %2601  ;;  %v2329_v0 = vmul.f32 -1.442695, %v3627_v36 }
 0x1ff   : > { %v2604_v13 = vpop.eup %2603 }
 0x200   : > { %1686 = vrot.lane.b32.xlu1 %v2604_v13, %s2838_s10  ;;  %v2606_v42 = vpop.eup %2605 }
 0x201   : > { %v2608_v21 = vpop.eup %2607 }
 0x202   : > { %1688 = vrot.lane.b32.xlu0 %v2602_v12, %s2838_s10  ;;  %v1484_v17 = vadd.f32 1.0, %v2608_v21  ;;  %v2610_v45 = vpop.eup %2609 }
 0x203   : > { %v2612_v6 = vpop.eup %2611  ;;  %v1486_v20 = vadd.f32 1.0, %v2610_v45 }
 0x204   : > { %1690 = vrot.lane.b32.xlu1 %v2606_v42, %s2838_s10  ;;  %2615 = vrcp.f32 %v1484_v17  ;;  %v1485_v34 = vadd.f32 1.0, %v2612_v6  ;;  %v2614_v9 = vpop.eup %2613 }
 0x205   : > { %2617 = vpow2.f32 %v2324_v52  ;;  %v1487_v55 = vadd.f32 1.0, %v2614_v9 }
 0x206   : > { %1584 = vrot.lane.b32.xlu0 %v1550_v57, %s2838_s10  ;;  %2619 = vrcp.f32 %v1486_v20 }
 0x207   : > { %2621 = vpow2.f32 %v2326_v29 }
 0x208   : > { %1586 = vrot.lane.b32.xlu1 %v1551_v23, %s2838_s10  ;;  %2623 = vrcp.f32 %v1485_v34 }
 0x209   : > { %2625 = vpow2.f32 %v2325_v2 }
 0x20a   : > { %1588 = vrot.lane.b32.xlu0 %v1552_v1, %s2838_s10  ;;  %2627 = vrcp.f32 %v1487_v55 }
 0x20b   : > { %2629 = vpow2.f32 %v2327_v38 }
 0x20c   : > { %1590 = vrot.lane.b32.xlu1 %v1553_v3, %s2838_s10 }
 0x20e   : > { %1592 = vrot.lane.b32.xlu0 %v1554_v19, %s2838_s10  ;;  %v3696_v10 = vpop.eup %2615 }
 0x20f   : > { %v2618_v18 = vpop.eup %2617 }
 0x210   : > { %1594 = vrot.lane.b32.xlu1 %v1555_v44, %s2838_s10  ;;  %v3702_v28 = vpop.eup %2619  ;;  %v1488_v48 = vadd.f32 1.0, %v2618_v18 }
 0x211   : > { %v2622_v39 = vpop.eup %2621 }
 0x212   : > { %1596 = vrot.lane.b32.xlu0 %v1556_v22, %s2838_s10  ;;  %v3705_v49 = vpop.eup %2623  ;;  %v1490_v58 = vadd.f32 1.0, %v2622_v39  ;;  %2631 = vrcp.f32 %v1488_v48 }
 0x213   : > { %v2626_v51 = vpop.eup %2625  ;;  %2633 = vpow2.f32 %v2328_v37 }
 0x214   : > { %1598 = vrot.lane.b32.xlu1 %v1557_v54, %s2838_s10  ;;  %v3712_v27 = vpop.eup %2627  ;;  %v1489_v4 = vadd.f32 1.0, %v2626_v51  ;;  %2635 = vrcp.f32 %v1490_v58  ;;  %v2332_v54 = vmul.f32 -1.442695, %v3638_v16  ;;  %v2333_v16 = vmul.f32 -1.442695, %v3645_v61 }
 0x215   : > { %v2630_v47 = vpop.eup %2629  ;;  %2637 = vpow2.f32 %v2330_v30 }
 0x216   : > { %1600 = vrot.lane.b32.xlu0 %v1558_v8, %s2838_s10  ;;  %v1491_v12 = vadd.f32 1.0, %v2630_v47  ;;  %2639 = vrcp.f32 %v1489_v4 }
 0x217   : > { %2641 = vpow2.f32 %v2329_v0 }
 0x218   : > { %1602 = vrot.lane.b32.xlu1 %v1559_v46, %s2838_s10  ;;  %2643 = vrcp.f32 %v1491_v12 }
 0x219   : > { %2645 = vpow2.f32 %v2331_v26 }
 0x21a   : > { %1604 = vrot.lane.b32.xlu0 %v1560_v24, %s2838_s10 }
 0x21c   : > { %1606 = vrot.lane.b32.xlu1 %v1561_v43, %s2838_s10  ;;  %v3718_v13 = vpop.eup %2631 }
 0x21d   : > { %v2634_v42 = vpop.eup %2633 }
 0x21e   : > { %1608 = vrot.lane.b32.xlu0 %v1562_v63, %s2838_s10  ;;  %v3721_v36 = vpop.eup %2635  ;;  %v1492_v19 = vadd.f32 1.0, %v2634_v42 }
 0x21f   : > { %v2638_v1 = vpop.eup %2637 }
 0x220   : > { %1610 = vrot.lane.b32.xlu1 %v1563_v5, %s2838_s10  ;;  %v3724_v3 = vpop.eup %2639  ;;  %v1494_v24 = vadd.f32 1.0, %v2638_v1  ;;  %2647 = vrcp.f32 %v1492_v19 }
 0x221   : > { %v2642_v35 = vpop.eup %2641  ;;  %2649 = vpow2.f32 %v2332_v54 }
 0x222   : > { %v3732_v43 = vpop.eup %2643  ;;  %v1493_v63 = vadd.f32 1.0, %v2642_v35  ;;  %2651 = vrcp.f32 %v1494_v24  ;;  %v1628_v24 = vmul.f32 %v3696_v10, %v3693_v31 }
 0x223   : > { %v2646_v40 = vpop.eup %2645  ;;  %2653 = vpow2.f32 %v2334_v32 }
 0x224   : > { %v1495_v53 = vadd.f32 1.0, %v2646_v40  ;;  %2655 = vrcp.f32 %v1493_v63 }
 0x225   : > { %2657 = vpow2.f32 %v2333_v16 }
 0x226   : > { %2659 = vrcp.f32 %v1495_v53 }
 0x227   : > { %2661 = vpow2.f32 %v2335_v33 }
 0x22a   : > { %v3738_v21 = vpop.eup %2647 }
 0x22b   : > { %v2650_v17 = vpop.eup %2649 }
 0x22c   : > { %v3740_v6 = vpop.eup %2651  ;;  %v1496_v29 = vadd.f32 1.0, %v2650_v17 }
 0x22d   : > { %v2654_v52 = vpop.eup %2653 }
 0x22e   : > { %v3743_v20 = vpop.eup %2655  ;;  %v1498_v38 = vadd.f32 1.0, %v2654_v52  ;;  %2663 = vrcp.f32 %v1496_v29 }
 0x22f   : > { %v2658_v34 = vpop.eup %2657 }
 0x230   : > { %2665 = vrcp.f32 %v1498_v38 }
 0x23f   : > { %v1661_v62 = vpop.permute.xlu0 %1660 }
 0x240   : > { %v1708_v15 = vmul.f32 %v3696_v10, %v1661_v62  ;;  %v3748_v62 = vpop.eup %2659 }
 0x241   : > { %v1663_v50 = vpop.permute.xlu1 %1662  ;;  %v2662_v18 = vpop.eup %2661 }
 0x242   : > { %1740 = vrot.lane.b32.xlu0 %v1708_v15, %s2838_s10  ;;  %v1709_v56 = vmul.f32 %v3705_v49, %v1663_v50  ;;  %v1497_v15 = vadd.f32 1.0, %v2658_v34  ;;  %v3754_v48 = vpop.eup %2663 }
 0x243   : > { %v1665_v41 = vpop.permute.xlu0 %1664  ;;  %v3757_v37 = vpop.eup %2665 }
 0x244   : > { %v1710_v11 = vmul.f32 %v3702_v28, %v1665_v41  ;;  %1742 = vrot.lane.b32.xlu1 %v1709_v56, %s2838_s10  ;;  %2667 = vrcp.f32 %v1497_v15 }
 0x245   : > { %v1667_v7 = vpop.permute.xlu1 %1666 }
 0x246   : > { %1744 = vrot.lane.b32.xlu0 %v1710_v11, %s2838_s10  ;;  %v1711_v25 = vmul.f32 %v3712_v27, %v1667_v7  ;;  %v1499_v11 = vadd.f32 1.0, %v2662_v18 }
 0x248   : > { %1746 = vrot.lane.b32.xlu1 %v1711_v25, %s2838_s10  ;;  %2669 = vrcp.f32 %v1499_v11 }
 0x24d   : > { %v1669_v57 = vpop.permute.xlu0 %1668 }
 0x24e   : > { %v1712_v23 = vmul.f32 %v3718_v13, %v1669_v57  ;;  %v3760_v56 = vpop.eup %2667 }
 0x24f   : > { %v1671_v44 = vpop.permute.xlu1 %1670 }
 0x250   : > { %1748 = vrot.lane.b32.xlu0 %v1712_v23, %s2838_s10  ;;  %v1713_v8 = vmul.f32 %v3724_v3, %v1671_v44 }
 0x251   : > { %v1673_v22 = vpop.permute.xlu0 %1672 }
 0x252   : > { %v1714_v46 = vmul.f32 %v3721_v36, %v1673_v22  ;;  %1750 = vrot.lane.b32.xlu1 %v1713_v8, %s2838_s10  ;;  %v3766_v47 = vpop.eup %2669 }
 0x253   : > { %v1675_v59 = vpop.permute.xlu1 %1674 }
 0x254   : > { %1752 = vrot.lane.b32.xlu0 %v1714_v46, %s2838_s10  ;;  %v1715_v5 = vmul.f32 %v3732_v43, %v1675_v59 }
 0x256   : > { %1754 = vrot.lane.b32.xlu1 %v1715_v5, %s2838_s10  ;;  %v1629_v5 = vmul.f32 %v3705_v49, %v3699_v14 }
 0x263   : > { %v1677_v45 = vpop.permute.xlu0 %1676 }
 0x264   : > { %v1716_v61 = vmul.f32 %v3738_v21, %v1677_v45 }
 0x265   : > { %v1679_v9 = vpop.permute.xlu1 %1678 }
 0x266   : > { %1756 = vrot.lane.b32.xlu0 %v1716_v61, %s2838_s10  ;;  %v1717_v2 = vmul.f32 %v3743_v20, %v1679_v9 }
 0x267   : > { %v1681_v60 = vpop.permute.xlu0 %1680 }
 0x268   : > { %v1718_v55 = vmul.f32 %v3740_v6, %v1681_v60  ;;  %1758 = vrot.lane.b32.xlu1 %v1717_v2, %s2838_s10 }
 0x269   : > { %v1683_v41 = vpop.permute.xlu1 %1682 }
 0x26a   : > { %1760 = vrot.lane.b32.xlu0 %v1718_v55, %s2838_s10  ;;  %v1719_v39 = vmul.f32 %v3748_v62, %v1683_v41 }
 0x26c   : > { %1762 = vrot.lane.b32.xlu1 %v1719_v39, %s2838_s10 }
 0x270   : > { %v1685_v50 = vpop.permute.xlu0 %1684 }
 0x271   : > { %v1720_v51 = vmul.f32 %v3754_v48, %v1685_v50 }
 0x272   : > { %v1687_v58 = vpop.permute.xlu1 %1686 }
 0x273   : > { %1764 = vrot.lane.b32.xlu0 %v1720_v51, %s2838_s10  ;;  %v1721_v4 = vmul.f32 %v3760_v56, %v1687_v58 }
 0x274   : > { %v1689_v30 = vpop.permute.xlu0 %1688 }
 0x275   : > { %v1722_v7 = vmul.f32 %v3757_v37, %v1689_v30  ;;  %1766 = vrot.lane.b32.xlu1 %v1721_v4, %s2838_s10 }
 0x276   : > { %v1691_v0 = vpop.permute.xlu1 %1690 }
 0x277   : > { %1768 = vrot.lane.b32.xlu0 %v1722_v7, %s2838_s10  ;;  %v1723_v25 = vmul.f32 %v3766_v47, %v1691_v0 }
 0x278   : > { %v1585_v12 = vpop.permute.xlu0 %1584 }
 0x279   : > { %1770 = vrot.lane.b32.xlu1 %v1723_v25, %s2838_s10  ;;  %v1630_v40 = vmul.f32 %v3702_v28, %v1585_v12 }
 0x27a   : > { %v1587_v26 = vpop.permute.xlu1 %1586 }
 0x27b   : > { %v1631_v31 = vmul.f32 %v3712_v27, %v1587_v26 }
 0x27c   : > { %v1589_v57 = vpop.permute.xlu0 %1588 }
 0x27d   : > { %v1632_v34 = vmul.f32 %v3718_v13, %v1589_v57 }
 0x27e   : > { %v1591_v42 = vpop.permute.xlu1 %1590 }
 0x27f   : > { %v1633_v55 = vmul.f32 %v3724_v3, %v1591_v42 }
 0x280   : > { %v1593_v23 = vpop.permute.xlu0 %1592 }
 0x281   : > { %v1634_v38 = vmul.f32 %v3721_v36, %v1593_v23 }
 0x282   : > { %v1595_v1 = vpop.permute.xlu1 %1594 }
 0x283   : > { %v1635_v11 = vmul.f32 %v3732_v43, %v1595_v1 }
 0x284   : > { %v1597_v19 = vpop.permute.xlu0 %1596 }
 0x285   : > { %v1636_v7 = vmul.f32 %v3738_v21, %v1597_v19 }
 0x286   : > { %v1599_v44 = vpop.permute.xlu1 %1598 }
 0x287   : > { %v1637_v26 = vmul.f32 %v3743_v20, %v1599_v44 }
 0x288   : > { %v1601_v22 = vpop.permute.xlu0 %1600 }
 0x289   : > { %v1638_v57 = vmul.f32 %v3740_v6, %v1601_v22 }
 0x28a   : > { %v3770_v35 = vpop.permute.xlu1 %1602 }
 0x28b   : > { %v1639_v19 = vmul.f32 %v3748_v62, %v3770_v35 }
 0x28c   : > { %v3772_v54 = vpop.permute.xlu0 %1604 }
 0x28d   : > { %v1640_v44 = vmul.f32 %v3754_v48, %v3772_v54 }
 0x28e   : > { %v3774_v8 = vpop.permute.xlu1 %1606 }
 0x28f   : > { %v1641_v35 = vmul.f32 %v3760_v56, %v3774_v8 }
 0x290   : > { %v3776_v46 = vpop.permute.xlu0 %1608 }
 0x292   : > { %v3780_v59 = vpop.permute.xlu1 %1610 }
 0x2b4   : > { %v1741_v32 = vpop.permute.xlu0 %1740 }
 0x2b5   : > { %v1788_v63 = vadd.f32 %v1741_v32, %v1628_v24 }
 0x2b6   : > { %v1743_v33 = vpop.permute.xlu1 %1742 }
 0x2b7   : > { %2671 = vtanh.f32 %v1788_v63  ;;  %1916 = vrot.lane.b32.xlu0 %v1788_v63, %s2839_s16  ;;  %v1789_v17 = vadd.f32 %v1743_v33, %v1629_v5 }
 0x2b8   : > { %v1745_v16 = vpop.permute.xlu0 %1744 }
 0x2b9   : > { %v3786_v53 = vadd.f32 %v1745_v16, %v1630_v40  ;;  %1918 = vrot.lane.b32.xlu1 %v1789_v17, %s2839_s16 }
 0x2ba   : > { %v1747_v45 = vpop.permute.xlu1 %1746 }
 0x2bb   : > { %2673 = vtanh.f32 %v3786_v53  ;;  %v3791_v61 = vadd.f32 %v1747_v45, %v1631_v31 }
 0x2bc   : > { %2675 = vtanh.f32 %v1789_v17  ;;  %v1642_v17 = vmul.f32 %v3757_v37, %v3776_v46 }
 0x2bd   : > { %2677 = vtanh.f32 %v3791_v61 }
 0x2c1   : > { %v2672_v52 = vpop.eup %2671 }
 0x2c2   : > { %1836 = vrot.lane.b32.xlu0 %v2672_v52, %s2838_s10  ;;  %v1749_v9 = vpop.permute.xlu0 %1748 }
 0x2c3   : > { %v3798_v60 = vadd.f32 %v1749_v9, %v1632_v34 }
 0x2c4   : > { %v1751_v15 = vpop.permute.xlu1 %1750 }
 0x2c5   : > { %v2674_v14 = vpop.eup %2673  ;;  %2679 = vtanh.f32 %v3798_v60  ;;  %v3804_v41 = vadd.f32 %v1751_v15, %v1633_v55 }
 0x2c6   : > { %1840 = vrot.lane.b32.xlu0 %v2674_v14, %s2838_s10  ;;  %v2676_v29 = vpop.eup %2675  ;;  %v1753_v18 = vpop.permute.xlu0 %1752 }
 0x2c7   : > { %1838 = vrot.lane.b32.xlu1 %v2676_v29, %s2838_s10  ;;  %v2678_v2 = vpop.eup %2677  ;;  %v3806_v39 = vadd.f32 %v1753_v18, %v1634_v38  ;;  %2681 = vtanh.f32 %v3804_v41  ;;  %v1643_v29 = vmul.f32 %v3766_v47, %v3780_v59 }
 0x2c8   : > { %v1755_v50 = vpop.permute.xlu1 %1754 }
 0x2c9   : > { %2683 = vtanh.f32 %v3806_v39  ;;  %v1795_v51 = vadd.f32 %v1755_v50, %v1635_v11 }
 0x2cb   : > { %1842 = vrot.lane.b32.xlu1 %v2678_v2, %s2838_s10  ;;  %2685 = vtanh.f32 %v1795_v51 }
 0x2cf   : > { %v2680_v58 = vpop.eup %2679 }
 0x2d0   : > { %1844 = vrot.lane.b32.xlu0 %v2680_v58, %s2838_s10 }
 0x2d1   : > { %v2682_v30 = vpop.eup %2681 }
 0x2d2   : > { %1846 = vrot.lane.b32.xlu1 %v2682_v30, %s2838_s10 }
 0x2d3   : > { %v2684_v4 = vpop.eup %2683 }
 0x2d4   : > { %1848 = vrot.lane.b32.xlu0 %v2684_v4, %s2838_s10 }
 0x2d5   : > { %v2686_v12 = vpop.eup %2685 }
 0x2d6   : > { %1850 = vrot.lane.b32.xlu1 %v2686_v12, %s2838_s10 }
 0x2d8   : > { %v1757_v0 = vpop.permute.xlu0 %1756 }
 0x2d9   : > { %v1796_v25 = vadd.f32 %v1757_v0, %v1636_v7 }
 0x2da   : > { %v1759_v42 = vpop.permute.xlu1 %1758 }
 0x2db   : > { %2687 = vtanh.f32 %v1796_v25  ;;  %v1797_v1 = vadd.f32 %v1759_v42, %v1637_v26 }
 0x2dc   : > { %v1761_v23 = vpop.permute.xlu0 %1760 }
 0x2dd   : > { %v1798_v24 = vadd.f32 %v1761_v23, %v1638_v57  ;;  %2689 = vtanh.f32 %v1797_v1 }
 0x2de   : > { %v1763_v32 = vpop.permute.xlu1 %1762 }
 0x2df   : > { %2691 = vtanh.f32 %v1798_v24  ;;  %v1799_v63 = vadd.f32 %v1763_v32, %v1639_v19 }
 0x2e1   : > { %2693 = vtanh.f32 %v1799_v63 }
 0x2e5   : > { %v2688_v40 = vpop.eup %2687  ;;  %v1765_v16 = vpop.permute.xlu0 %1764 }
 0x2e6   : > { %1852 = vrot.lane.b32.xlu0 %v2688_v40, %s2838_s10  ;;  %v1800_v33 = vadd.f32 %v1765_v16, %v1640_v44 }
 0x2e7   : > { %v2690_v22 = vpop.eup %2689  ;;  %v1767_v45 = vpop.permute.xlu1 %1766 }
 0x2e8   : > { %1854 = vrot.lane.b32.xlu1 %v2690_v22, %s2838_s10  ;;  %2695 = vtanh.f32 %v1800_v33  ;;  %v1801_v14 = vadd.f32 %v1767_v45, %v1641_v35 }
 0x2e9   : > { %v2692_v5 = vpop.eup %2691  ;;  %v1769_v52 = vpop.permute.xlu0 %1768 }
 0x2ea   : > { %1856 = vrot.lane.b32.xlu0 %v2692_v5, %s2838_s10  ;;  %v1802_v54 = vadd.f32 %v1769_v52, %v1642_v17  ;;  %2697 = vtanh.f32 %v1801_v14 }
 0x2eb   : > { %v2694_v31 = vpop.eup %2693  ;;  %v1771_v34 = vpop.permute.xlu1 %1770 }
 0x2ec   : > { %1858 = vrot.lane.b32.xlu1 %v2694_v31, %s2838_s10  ;;  %2699 = vtanh.f32 %v1802_v54  ;;  %v1803_v9 = vadd.f32 %v1771_v34, %v1643_v29 }
 0x2ee   : > { %2701 = vtanh.f32 %v1803_v9 }
 0x2f2   : > { %v2696_v8 = vpop.eup %2695 }
 0x2f3   : > { %1860 = vrot.lane.b32.xlu0 %v2696_v8, %s2838_s10 }
 0x2f4   : > { %v2698_v46 = vpop.eup %2697 }
 0x2f5   : > { %1862 = vrot.lane.b32.xlu1 %v2698_v46, %s2838_s10 }
 0x2f6   : > { %v2700_v2 = vpop.eup %2699 }
 0x2f7   : > { %1864 = vrot.lane.b32.xlu0 %v2700_v2, %s2838_s10 }
 0x2f8   : > { %v2702_v55 = vpop.eup %2701 }
 0x2f9   : > { %1866 = vrot.lane.b32.xlu1 %v2702_v55, %s2838_s10  ;;  %s2240_s10 = sshll.u32 %s3856_s29, 7 }
 0x2fa   : > { %s3861_s14 = scalar_lea.vmem [#allocation4], %s2240_s10 }
 0x2fb   : > { %1920 = vrot.lane.b32.xlu0 %v3786_v53, %s2839_s16  ;;  %s2101_s17 = sshll.u32 %s3861_s14, 4  ;;  %s3938_s17 = int_to_ptr.vmem [resolvable:$true] %s2101_s17 }
 0x2fc   : > { %s2703_s26 = scalar_lea.vmem %s3938_s17, 2048 }
 0x2fd   : > { %1922 = vrot.lane.b32.xlu1 %v3791_v61, %s2839_s16  ;;  %p2704_p0 = scmp.ne.s32.totalorder %s3938_s17, %s2703_s26 }
 0x2ff   : > { %1924 = vrot.lane.b32.xlu0 %v3798_v60, %s2839_s16  ;;  %p2705_p1 = pnand %p2704_p0, %p2926_p3 }
 0x301   : > { %1926 = vrot.lane.b32.xlu1 %v3804_v41, %s2839_s16  ;;  %p2706_p2 = pneg %p2705_p1 }
 0x303   : > { %1928 = vrot.lane.b32.xlu0 %v3806_v39, %s2839_s16 }
 0x305   : > { %1930 = vrot.lane.b32.xlu1 %v1795_v51, %s2839_s16 }
 0x307   : > { %1932 = vrot.lane.b32.xlu0 %v1796_v25, %s2839_s16 }
 0x309   : > { %1934 = vrot.lane.b32.xlu1 %v1797_v1, %s2839_s16 }
 0x30b   : > { %1936 = vrot.lane.b32.xlu0 %v1798_v24, %s2839_s16 }
 0x30d   : > { %1938 = vrot.lane.b32.xlu1 %v1799_v63, %s2839_s16 }
 0x30f   : > { %1940 = vrot.lane.b32.xlu0 %v1800_v33, %s2839_s16 }
 0x311   : > { %1942 = vrot.lane.b32.xlu1 %v1801_v14, %s2839_s16 }
 0x313   : > { %1944 = vrot.lane.b32.xlu0 %v1802_v54, %s2839_s16 }
 0x315   : > { %1946 = vrot.lane.b32.xlu1 %v1803_v9, %s2839_s16  ;;  %s2841_s16 = smov [#allocation4]  }
 0x329   : > { %v1917_v59 = vpop.permute.xlu0 %1916 }
 0x32a   : > { %1964 = vst.msk [vmem:[%s3861_s14] sm:$0xff] %vm1033_vm14, %v1917_v59 }
 0x32b   : > { %v1919_v53 = vpop.permute.xlu1 %1918 }
 0x32c   : > { %1965 = vst.msk [vmem:[%s3861_s14 + $0x8] sm:$0xff] %vm1033_vm14, %v1919_v53 }
 0x334   : > { %v1837_v61 = vpop.permute.xlu0 %1836 }
 0x335   : > { %v1884_v60 = vmul.f32 %v3696_v10, %v1837_v61 }
 0x337   : > { %1996 = vrot.lane.b32.xlu0 %v1884_v60, %s2840_s9 }
 0x338   : > { %v1841_v38 = vpop.permute.xlu0 %1840 }
 0x339   : > { %v1886_v15 = vmul.f32 %v3702_v28, %v1841_v38  ;;  %v1839_v18 = vpop.permute.xlu1 %1838 }
 0x33a   : > { %v1885_v41 = vmul.f32 %v3705_v49, %v1839_v18 }
 0x33b   : > { %2000 = vrot.lane.b32.xlu0 %v1886_v15, %s2840_s9 }
 0x33c   : > { %1998 = vrot.lane.b32.xlu1 %v1885_v41, %s2840_s9 }
 0x33d   : > { %v1843_v39 = vpop.permute.xlu1 %1842 }
 0x33e   : > { %v1887_v11 = vmul.f32 %v3712_v27, %v1843_v39 }
 0x340   : > { %2002 = vrot.lane.b32.xlu1 %v1887_v11, %s2840_s9 }
 0x342   : > { %v1845_v50 = vpop.permute.xlu0 %1844 }
 0x343   : > { %v1888_v10 = vmul.f32 %v3718_v13, %v1845_v50 }
 0x344   : > { %v1847_v51 = vpop.permute.xlu1 %1846 }
 0x345   : > { %2004 = vrot.lane.b32.xlu0 %v1888_v10, %s2840_s9  ;;  %v1889_v28 = vmul.f32 %v3724_v3, %v1847_v51 }
 0x346   : > { %v1849_v58 = vpop.permute.xlu0 %1848 }
 0x347   : > { %v1890_v49 = vmul.f32 %v3721_v36, %v1849_v58  ;;  %2006 = vrot.lane.b32.xlu1 %v1889_v28, %s2840_s9 }
 0x348   : > { %v1851_v30 = vpop.permute.xlu1 %1850 }
 0x349   : > { %2008 = vrot.lane.b32.xlu0 %v1890_v49, %s2840_s9  ;;  %v1891_v27 = vmul.f32 %v3732_v43, %v1851_v30 }
 0x34b   : > { %2010 = vrot.lane.b32.xlu1 %v1891_v27, %s2840_s9 }
 0x358   : > { %v1853_v4 = vpop.permute.xlu0 %1852 }
 0x359   : > { %v1892_v13 = vmul.f32 %v3738_v21, %v1853_v4 }
 0x35a   : > { %v1855_v7 = vpop.permute.xlu1 %1854 }
 0x35b   : > { %2012 = vrot.lane.b32.xlu0 %v1892_v13, %s2840_s9  ;;  %v1893_v3 = vmul.f32 %v3743_v20, %v1855_v7 }
 0x35c   : > { %v1857_v0 = vpop.permute.xlu0 %1856 }
 0x35d   : > { %v1894_v36 = vmul.f32 %v3740_v6, %v1857_v0  ;;  %2014 = vrot.lane.b32.xlu1 %v1893_v3, %s2840_s9 }
 0x35e   : > { %v1859_v25 = vpop.permute.xlu1 %1858 }
 0x35f   : > { %2016 = vrot.lane.b32.xlu0 %v1894_v36, %s2840_s9  ;;  %v1895_v43 = vmul.f32 %v3748_v62, %v1859_v25 }
 0x361   : > { %2018 = vrot.lane.b32.xlu1 %v1895_v43, %s2840_s9 }
 0x365   : > { %v1861_v21 = vpop.permute.xlu0 %1860 }
 0x366   : > { %v1896_v12 = vmul.f32 %v3754_v48, %v1861_v21 }
 0x367   : > { %v1863_v20 = vpop.permute.xlu1 %1862 }
 0x368   : > { %2020 = vrot.lane.b32.xlu0 %v1896_v12, %s2840_s9  ;;  %v1897_v6 = vmul.f32 %v3760_v56, %v1863_v20 }
 0x369   : > { %v1865_v26 = vpop.permute.xlu0 %1864 }
 0x36a   : > { %v1898_v57 = vmul.f32 %v3757_v37, %v1865_v26  ;;  %2022 = vrot.lane.b32.xlu1 %v1897_v6, %s2840_s9 }
 0x36b   : > { %v1867_v62 = vpop.permute.xlu1 %1866 }
 0x36c   : > { %2024 = vrot.lane.b32.xlu0 %v1898_v57, %s2840_s9  ;;  %v1899_v48 = vmul.f32 %v3766_v47, %v1867_v62 }
 0x36d   : > { %v1921_v42 = vpop.permute.xlu0 %1920 }
 0x36e   : > { %1966 = vst.msk [vmem:[%s3861_s14 + $0x10] sm:$0xff] %vm1033_vm14, %v1921_v42  ;;  %2026 = vrot.lane.b32.xlu1 %v1899_v48, %s2840_s9  ;;  %s2707_s9 = sshll.u32 %s2841_s16, 4  ;;  %s2708_s9 = int_to_ptr.vmem [resolvable:$false] %s2707_s9 }
 0x36f   : > { %v1923_v56 = vpop.permute.xlu1 %1922  ;;  %s2709_s8 = scalar_lea.vmem %s2708_s9, 4096  ;;  %p2710_p4 = scmp.lt.s32.totalorder %s3938_s17, %s2708_s9 }
 0x370   : > { %1967 = vst.msk [vmem:[%s3861_s14 + $0x18] sm:$0xff] %vm1033_vm14, %v1923_v56  ;;  %p2711_p5 = scmp.lt.s32.totalorder %s2709_s8, %s2703_s26 }
 0x371   : > { %v1925_v37 = vpop.permute.xlu0 %1924 }
 0x372   : > { %1968 = vst.msk [vmem:[%s3861_s14 + $0x20] sm:$0xff] %vm1033_vm14, %v1925_v37  ;;  %p2712_p6 = por %p2711_p5, %p2710_p4 }
 0x373   : > { %v1927_v23 = vpop.permute.xlu1 %1926 }
 0x374   : > { %1969 = vst.msk [vmem:[%s3861_s14 + $0x28] sm:$0xff] %vm1033_vm14, %v1927_v23  ;;  %p2713_p7 = pnand %p2712_p6, %p2706_p2 }
 0x375   : > { %v1929_v47 = vpop.permute.xlu0 %1928 }
 0x376   : > { %1970 = vst.msk [vmem:[%s3861_s14 + $0x30] sm:$0xff] %vm1033_vm14, %v1929_v47 }
 0x377   : > { %v1931_v1 = vpop.permute.xlu1 %1930 }
 0x378   : > { %1971 = vst.msk [vmem:[%s3861_s14 + $0x38] sm:$0xff] %vm1033_vm14, %v1931_v1 }
 0x379   : > { %v1933_v24 = vpop.permute.xlu0 %1932 }
 0x37a   : > { %1972 = vst.msk [vmem:[%s3861_s14 + $0x40] sm:$0xff] %vm1033_vm14, %v1933_v24 }
 0x37b   : > { %v1935_v19 = vpop.permute.xlu1 %1934 }
 0x37c   : > { %1973 = vst.msk [vmem:[%s3861_s14 + $0x48] sm:$0xff] %vm1033_vm14, %v1935_v19 }
 0x37d   : > { %v1937_v32 = vpop.permute.xlu0 %1936 }
 0x37e   : > { %1974 = vst.msk [vmem:[%s3861_s14 + $0x50] sm:$0xff] %vm1033_vm14, %v1937_v32 }
 0x37f   : > { %v1939_v63 = vpop.permute.xlu1 %1938 }
 0x380   : > { %1975 = vst.msk [vmem:[%s3861_s14 + $0x58] sm:$0xff] %vm1033_vm14, %v1939_v63 }
 0x381   : > { %v1941_v40 = vpop.permute.xlu0 %1940 }
 0x382   : > { %1976 = vst.msk [vmem:[%s3861_s14 + $0x60] sm:$0xff] %vm1033_vm14, %v1941_v40 }
 0x383   : > { %v1943_v44 = vpop.permute.xlu1 %1942 }
 0x384   : > { %1977 = vst.msk [vmem:[%s3861_s14 + $0x68] sm:$0xff] %vm1033_vm14, %v1943_v44 }
 0x385   : > { %v1945_v22 = vpop.permute.xlu0 %1944 }
 0x386   : > { %1978 = vst.msk [vmem:[%s3861_s14 + $0x70] sm:$0xff] %vm1033_vm14, %v1945_v22 }
 0x387   : > { %v1947_v16 = vpop.permute.xlu1 %1946 }
 0x388   : > { %1979 = vst.msk [vmem:[%s3861_s14 + $0x78] sm:$0xff] %vm1033_vm14, %v1947_v16 }
 0x389   : > { %2716 = shalt.err (!%p2713_p7)
}
 0x38a   : > { %s2717_s14 = scalar_lea.hbm %s3936_s27, 2048  ;;  %s2721_s22 = scalar_lea.hbm %s4075_s5, 8192 }
 0x38b   : > { %p2718_p9 = scmp.ne.s32.totalorder %s3936_s27, %s2717_s14  ;;  %p2722_p12 = scmp.lt.u32.totalorder %s3936_s27, %s4075_s5 }
 0x38c   : > { %p2723_p13 = scmp.lt.u32.totalorder %s2721_s22, %s2717_s14  ;;  %p2725_p1 = scmp.lt.u32.totalorder %s2717_s14, %s3936_s27 }
 0x38d   : > { %p2719_p10 = pnand %p2718_p9, %p2926_p3 }
 0x38e   : > { %p2724_p0 = por %p2723_p13, %p2722_p12 }
 0x38f   : > { %p2720_p11 = pneg %p2719_p10 }
 0x390   : > { %p2726_p2 = por %p2725_p1, %p2724_p0 }
 0x392   : > { %p2727_p4 = pnand %p2726_p2, %p2720_p11 }
 0x394   : > { %2730 = shalt.err (!%p2727_p4)
}
 0x395   : > { %s2842_s26 = smov 128   ;;  %s2843_s8 = smov 8  }
 0x396   : > { %2457 = dma.vmem_to_hbm [thread:$0]  (%p2926_p3), %s3938_s17, 2048, %s3936_s27, %s2066_s15, %s2842_s26, %s2842_s26, %s2843_s8  }
 0x397   : > { %s3971_s30 = scalar_lea.vmem [#allocation2], %s2240_s10  ;;  %s4009_s15 = scalar_lea.hbm %s4074_s4, %s2341_s12 }
 0x398   : > { %s2082_s10 = sshll.u32 %s3971_s30, 4  ;;  %s2061_s14 = scalar_lea.sflag [#allocation3], %s3856_s29  ;;  %s4011_s10 = int_to_ptr.vmem [resolvable:$true] %s2082_s10 }
 0x399   : > { %s2731_s21 = scalar_lea.vmem %s4011_s10, 2048  ;;  %s2844_s13 = smov [#allocation2]  }
 0x39a   : > { %p2732_p5 = scmp.ne.s32.totalorder %s4011_s10, %s2731_s21  ;;  %s2735_s22 = sshll.u32 %s2844_s13, 4  ;;  %s2736_s22 = int_to_ptr.vmem [resolvable:$false] %s2735_s22 }
 0x39b   : > { %s2737_s16 = scalar_lea.vmem %s2736_s22, 4096  ;;  %p2738_p9 = scmp.lt.s32.totalorder %s4011_s10, %s2736_s22 }
 0x39c   : > { %p2733_p6 = pnand %p2732_p5, %p2926_p3  ;;  %p2739_p10 = scmp.lt.s32.totalorder %s2737_s16, %s2731_s21 }
 0x39e   : > { %p2734_p7 = pneg %p2733_p6  ;;  %p2740_p11 = por %p2739_p10, %p2738_p9 }
 0x3a0   : > { %p2741_p12 = pnand %p2740_p11, %p2734_p7 }
 0x3a9   : > { %v1997_v5 = vpop.permute.xlu0 %1996 }
 0x3aa   : > { %2044 = vst.msk [vmem:[%s3971_s30] sm:$0xff] %vm1033_vm14, %v1997_v5 }
 0x3ad   : > { %v2001_v33 = vpop.permute.xlu0 %2000 }
 0x3ae   : > { %2046 = vst.msk [vmem:[%s3971_s30 + $0x10] sm:$0xff] %vm1033_vm14, %v2001_v33  ;;  %v1999_v35 = vpop.permute.xlu1 %1998 }
 0x3af   : > { %2045 = vst.msk [vmem:[%s3971_s30 + $0x8] sm:$0xff] %vm1033_vm14, %v1999_v35 }
 0x3b2   : > { %v2003_v17 = vpop.permute.xlu1 %2002 }
 0x3b3   : > { %2047 = vst.msk [vmem:[%s3971_s30 + $0x18] sm:$0xff] %vm1033_vm14, %v2003_v17 }
 0x3b7   : > { %v2005_v31 = vpop.permute.xlu0 %2004 }
 0x3b8   : > { %2048 = vst.msk [vmem:[%s3971_s30 + $0x20] sm:$0xff] %vm1033_vm14, %v2005_v31 }
 0x3b9   : > { %v2007_v45 = vpop.permute.xlu1 %2006 }
 0x3ba   : > { %2049 = vst.msk [vmem:[%s3971_s30 + $0x28] sm:$0xff] %vm1033_vm14, %v2007_v45 }
 0x3bb   : > { %v2009_v52 = vpop.permute.xlu0 %2008 }
 0x3bc   : > { %2050 = vst.msk [vmem:[%s3971_s30 + $0x30] sm:$0xff] %vm1033_vm14, %v2009_v52 }
 0x3bd   : > { %v2011_v14 = vpop.permute.xlu1 %2010 }
 0x3be   : > { %2051 = vst.msk [vmem:[%s3971_s30 + $0x38] sm:$0xff] %vm1033_vm14, %v2011_v14 }
 0x3cd   : > { %v2013_v54 = vpop.permute.xlu0 %2012 }
 0x3ce   : > { %2052 = vst.msk [vmem:[%s3971_s30 + $0x40] sm:$0xff] %vm1033_vm14, %v2013_v54 }
 0x3cf   : > { %v2015_v29 = vpop.permute.xlu1 %2014 }
 0x3d0   : > { %2053 = vst.msk [vmem:[%s3971_s30 + $0x48] sm:$0xff] %vm1033_vm14, %v2015_v29 }
 0x3d1   : > { %v2017_v34 = vpop.permute.xlu0 %2016 }
 0x3d2   : > { %2054 = vst.msk [vmem:[%s3971_s30 + $0x50] sm:$0xff] %vm1033_vm14, %v2017_v34 }
 0x3d3   : > { %v2019_v9 = vpop.permute.xlu1 %2018 }
 0x3d4   : > { %2055 = vst.msk [vmem:[%s3971_s30 + $0x58] sm:$0xff] %vm1033_vm14, %v2019_v9 }
 0x3da   : > { %v2021_v8 = vpop.permute.xlu0 %2020 }
 0x3db   : > { %2056 = vst.msk [vmem:[%s3971_s30 + $0x60] sm:$0xff] %vm1033_vm14, %v2021_v8 }
 0x3dc   : > { %v2023_v46 = vpop.permute.xlu1 %2022 }
 0x3dd   : > { %2057 = vst.msk [vmem:[%s3971_s30 + $0x68] sm:$0xff] %vm1033_vm14, %v2023_v46 }
 0x3de   : > { %v2025_v2 = vpop.permute.xlu0 %2024 }
 0x3df   : > { %2058 = vst.msk [vmem:[%s3971_s30 + $0x70] sm:$0xff] %vm1033_vm14, %v2025_v2 }
 0x3e0   : > { %v2027_v55 = vpop.permute.xlu1 %2026 }
 0x3e1   : > { %2059 = vst.msk [vmem:[%s3971_s30 + $0x78] sm:$0xff] %vm1033_vm14, %v2027_v55 }
 0x3e2   : > { %2744 = shalt.err (!%p2741_p12)
}
 0x3e3   : > { %s2745_s12 = scalar_lea.hbm %s4009_s15, 2048  ;;  %s2749_s17 = scalar_lea.hbm %s4074_s4, 8192 }
 0x3e4   : > { %p2746_p13 = scmp.ne.s32.totalorder %s4009_s15, %s2745_s12  ;;  %p2750_p2 = scmp.lt.u32.totalorder %s4009_s15, %s4074_s4 }
 0x3e5   : > { %p2751_p4 = scmp.lt.u32.totalorder %s2749_s17, %s2745_s12  ;;  %p2753_p6 = scmp.lt.u32.totalorder %s2745_s12, %s4009_s15 }
 0x3e6   : > { %p2747_p0 = pnand %p2746_p13, %p2926_p3 }
 0x3e7   : > { %p2752_p5 = por %p2751_p4, %p2750_p2 }
 0x3e8   : > { %p2748_p1 = pneg %p2747_p0 }
 0x3e9   : > { %p2754_p7 = por %p2753_p6, %p2752_p5 }
 0x3eb   : > { %p2755_p9 = pnand %p2754_p7, %p2748_p1 }
 0x3ed   : > { %2758 = shalt.err (!%p2755_p9)
}
 0x3ee   : > { %2456 = dma.vmem_to_hbm [thread:$0]  (%p2926_p3), %s4011_s10, 2048, %s4009_s15, %s2061_s14, %s2842_s26, %s2842_s26, %s2843_s8  }
 0x3ef PF: > { %p2467_p10 = scmp.ge.s32.totalorder %s2829_s25, 2  ;;  %s2116_s21 = sand.u32 1, %s2801_s18  }
 0x3f0   : > { %s2117_s22 = scalar_lea.sflag [#allocation3], %s2116_s21 }
 0x3f1   : > { %p2461_p11 = pnand %p2467_p10, %p2935_p8 }
 0x3f3   : > { %2792 = dma.done.wait (!%p2461_p11), %s2117_s22, 2048  }
 0x3f4   : > { %2794 = vsyncadd (!%p2461_p11), %s2117_s22, 4294965248  ;;  %s2126_s6 = scalar_lea.sflag [#allocation5], %s2116_s21 }
 0x3f5   : > { %2796 = dma.done.wait (!%p2461_p11), %s2126_s6, 2048  }
 0x3f6   : > { %2798 = vsyncadd (!%p2461_p11), %s2126_s6, 4294965248  ;;  %s22_s25 = sadd.s32 1, %s2829_s25   ;;  %s4084_s29 = sld [smem:[#allocation8_spill]] }
 0x3f7   : > { %p19_p12 = scmp.ge.s32.totalorder %s22_s25, 6   ;;  %s4085_s18 = smov %s2805_s19 }
 0x3f8   : > { %s4086_s19 = smov %s2809_s20  ;;  %s4087_s20 = smov %s2944_s11 }
 0x3f9   : > { %s4088_s21 = smov %s2821_s23  ;;  %s4089_s22 = smov %s2825_s24 }
 0x3fa   : > { %s4090_s23 = smov %s4093_s28  ;;  %21 = sbr.rel (!%p19_p12) target bundleno = 7 (0x7), region = 92 }
 0x3fc   : > { %s4091_s24 = smov %s4084_s29 }
 0x401   :  { %2131 = vsyncpa [#allocation3], 1 }
 0x402   :  { %2133 = vsyncpa [#allocation3 + $0x1], 1 }
 0x403   :  { %2134 = vsyncpa [#allocation5], 1 }
 0x404   :  { %2136 = vsyncpa [#allocation5 + $0x1], 1 }

</bundles_post_ra>
